<compile_context>
chip_gen: v5e
topology: v5e:2x2
jax: 0.10.0
libtpu: 0.0.40
codegen_flags: <defaults>
</compile_context>

<pallas_src>
import functools

import jax
import jax.numpy as jnp
from jax.experimental import pallas as pl
from jax.experimental.pallas import tpu as pltpu


def _round_up(x, m):
    return (x + m - 1) // m * m


def _encoder_kernel(tokens_ref, emb_ref, w_enc_ref, b_enc_ref,
                    w_mulv_ref, b_mulv_ref,
                    enc_out_ref, mask_ref, mulv_ref):
    tokens = tokens_ref[...]                                   # (TB, Sp) int32
    TB, Sp = tokens.shape
    Vp = emb_ref.shape[0]

    # ---- get_text_field_mask: padding id == 0 ---------------------------
    mask_bool = tokens != 0                                    # (TB, Sp)
    mask_ref[...] = mask_bool.astype(jnp.int32)

    # ---- masked token-count matrix: counts[b, v] = #{s: tok[b,s]==v, v!=0}
    vocab_iota = jax.lax.broadcasted_iota(jnp.int32, (TB, Sp, Vp), 2)
    onehot = (vocab_iota == tokens[:, :, None]).astype(jnp.float32)
    counts = jnp.sum(onehot, axis=1)                           # (TB, Vp)
    lane_v = jax.lax.broadcasted_iota(jnp.int32, (TB, Vp), 1)
    counts = jnp.where(lane_v == 0, 0.0, counts)               # drop pad column

    # ---- bag-of-embeddings sum via one bf16 MXU matmul (B,V)@(V,E) -------
    # counts are small integers -> exact in bf16; accumulate in f32.
    summed = jnp.dot(counts.astype(jnp.bfloat16), emb_ref[...],
                     preferred_element_type=jnp.float32)       # (TB, Ep)

    # ---- masked mean pool (reciprocal on EUP) ----------------------------
    ntok = jnp.sum(mask_bool.astype(jnp.float32), axis=1, keepdims=True)
    denom = jnp.maximum(ntok, 1.0)
    pooled = summed * pl.reciprocal(denom, approx=True)        # (TB, Ep)

    # ---- Seq2Vec encoder head: dense + tanh ------------------------------
    h = jnp.tanh(jnp.dot(pooled, w_enc_ref[...],
                         preferred_element_type=jnp.float32) + b_enc_ref[...])
    enc_out_ref[...] = h                                       # (TB, Hp)

    # ---- fused variational projections: [mu | logvar] in one matmul ------
    mulv_ref[...] = jnp.dot(h, w_mulv_ref[...],
                            preferred_element_type=jnp.float32) + b_mulv_ref[...]
    # TODO(synk): KL Average() metric is host-side bookkeeping; base-class
    # forward() is abstract — neither is part of the device kernel.


@functools.partial(jax.jit, static_argnames=("batch_tile",))
def variational_encode(tokens, emb_table, w_enc, b_enc, w_mu, b_mu, w_lv, b_lv,
                       *, batch_tile=128):
    B, S = tokens.shape
    V, E = emb_table.shape
    H = w_enc.shape[1]
    L = w_mu.shape[1]

    # Tile / pad sizes: batch tile multiple of 8; feature dims -> 128 lanes.
    TB = _round_up(max(1, min(batch_tile, B)), 8)
    Bp = _round_up(B, TB)
    Sp = _round_up(S, 128)
    Vp = _round_up(V, 128)
    Ep = _round_up(E, 128)
    Hp = _round_up(H, 128)
    P2L = _round_up(2 * L, 128)

    f32 = jnp.float32
    tokens_p = jnp.zeros((Bp, Sp), jnp.int32).at[:B, :S].set(tokens)
    # TODO(synk): for production vocab sizes (V ~ 30k+), replace the resident
    # count-matrix matmul with a DMA row gather (PrefetchScalarGridSpec +
    # pl.Element) so the table is not VMEM-resident (v7x has 64 MiB VMEM).
    emb_p = jnp.zeros((Vp, Ep), f32).at[:V, :E].set(emb_table).astype(jnp.bfloat16)
    w_enc_p = jnp.zeros((Ep, Hp), f32).at[:E, :H].set(w_enc)
    b_enc_p = jnp.zeros((1, Hp), f32).at[:, :H].set(b_enc.reshape(1, H))
    w_mulv = jnp.concatenate([w_mu, w_lv], axis=1)             # (H, 2L)
    b_mulv = jnp.concatenate([b_mu.reshape(1, L), b_lv.reshape(1, L)], axis=1)
    w_mulv_p = jnp.zeros((Hp, P2L), f32).at[:H, :2 * L].set(w_mulv)
    b_mulv_p = jnp.zeros((1, P2L), f32).at[:, :2 * L].set(b_mulv)

    grid = (Bp // TB,)

    enc_out_p, mask_p, mulv_p = pl.pallas_call(
        _encoder_kernel,
        out_shape=(
            jax.ShapeDtypeStruct((Bp, Hp), f32),      # encoder_outputs (padded)
            jax.ShapeDtypeStruct((Bp, Sp), jnp.int32),  # mask (padded)
            jax.ShapeDtypeStruct((Bp, P2L), f32),     # [mu | logvar] (padded)
        ),
        grid=grid,
        in_specs=[
            pl.BlockSpec((TB, Sp), lambda i: (i, 0)),     # tokens (batch tiled)
            pl.BlockSpec((Vp, Ep), lambda i: (0, 0)),     # embedding table (resident)
            pl.BlockSpec((Ep, Hp), lambda i: (0, 0)),     # encoder weight
            pl.BlockSpec((1, Hp), lambda i: (0, 0)),      # encoder bias
            pl.BlockSpec((Hp, P2L), lambda i: (0, 0)),    # fused [w_mu | w_lv]
            pl.BlockSpec((1, P2L), lambda i: (0, 0)),     # fused [b_mu | b_lv]
        ],
        out_specs=(
            pl.BlockSpec((TB, Hp), lambda i: (i, 0)),
            pl.BlockSpec((TB, Sp), lambda i: (i, 0)),
            pl.BlockSpec((TB, P2L), lambda i: (i, 0)),
        ),
        compiler_params=pltpu.CompilerParams(
            dimension_semantics=("parallel",)),
    )(tokens_p, emb_p, w_enc_p, b_enc_p, w_mulv_p, b_mulv_p)

    enc_out = enc_out_p[:B, :H]
    mask = mask_p[:B, :S]
    mu = mulv_p[:B, :L]
    logvar = mulv_p[:B, L:2 * L]
    return enc_out, mask, mu, logvar


def _reference(tokens, emb_table, w_enc, b_enc, w_mu, b_mu, w_lv, b_lv):
    mask = (tokens != 0)
    mask_f = mask.astype(jnp.float32)
    emb = emb_table[tokens]                                    # (B,S,E)
    summed = jnp.sum(emb * mask_f[:, :, None], axis=1)
    counts = jnp.maximum(jnp.sum(mask_f, axis=1, keepdims=True), 1.0)
    pooled = summed / counts
    h = jnp.tanh(pooled @ w_enc + b_enc)
    return h, mask.astype(jnp.int32), h @ w_mu + b_mu, h @ w_lv + b_lv


if __name__ == "__main__":
    B, S, V, E, H, L = 8, 8, 64, 32, 32, 16

    key = jax.random.PRNGKey(0)
    k_tok, k_emb, k_we, k_wm, k_wl = jax.random.split(key, 5)

    tokens = jax.random.randint(k_tok, (B, S), 0, V, dtype=jnp.int32)
    # force some padding in the tail so the mask is nontrivial
    tokens = tokens.at[:, -2:].set(0)

    emb_table = 0.02 * jax.random.normal(k_emb, (V, E), dtype=jnp.float32)
    w_enc = 0.1 * jax.random.normal(k_we, (E, H), dtype=jnp.float32)
    b_enc = jnp.zeros((1, H), dtype=jnp.float32)
    w_mu = 0.1 * jax.random.normal(k_wm, (H, L), dtype=jnp.float32)
    b_mu = jnp.zeros((1, L), dtype=jnp.float32)
    w_lv = 0.1 * jax.random.normal(k_wl, (H, L), dtype=jnp.float32)
    b_lv = jnp.zeros((1, L), dtype=jnp.float32)

    enc_out, mask, mu, logvar = jax.block_until_ready(
        variational_encode(tokens, emb_table, w_enc, b_enc,
                           w_mu, b_mu, w_lv, b_lv))

    r_enc, r_mask, r_mu, r_lv = _reference(tokens, emb_table, w_enc, b_enc,
                                           w_mu, b_mu, w_lv, b_lv)

    # Tolerance relaxed vs f32 reference: bf16 embedding table + approx EUP
    # reciprocal inside the kernel (both well under 5e-3 here).
    assert jnp.allclose(enc_out, r_enc, atol=5e-3)
    assert jnp.array_equal(mask, r_mask)
    assert jnp.allclose(mu, r_mu, atol=5e-3)
    assert jnp.allclose(logvar, r_lv, atol=5e-3)

    print("KERNEL_OK")
</pallas_src>

<mosaic_0001>
module attributes {stable_mosaic.version = 11 : i64} {
  func.func @_encoder_kernel(%arg0: i32, %arg1: memref<8x128xi32, #tpu.memory_space<vmem>>, %arg2: memref<128x128xbf16, #tpu.memory_space<vmem>>, %arg3: memref<128x128xf32, #tpu.memory_space<vmem>>, %arg4: memref<1x128xf32, #tpu.memory_space<vmem>>, %arg5: memref<128x128xf32, #tpu.memory_space<vmem>>, %arg6: memref<1x128xf32, #tpu.memory_space<vmem>>, %arg7: memref<8x128xf32, #tpu.memory_space<vmem>>, %arg8: memref<8x128xi32, #tpu.memory_space<vmem>>, %arg9: memref<8x128xf32, #tpu.memory_space<vmem>>) attributes {dimension_semantics = [#tpu.dimension_semantics<parallel>], iteration_bounds = array<i64: 1>, scalar_prefetch = 0 : i64, scratch_operands = 0 : i64, tpu.core_type = #tpu.core_type<tc>, window_params = [{transform_indices = @transform_0, window_bounds = array<i64: 8, 128>}, {pipeline_mode = #tpu.pipeline_mode<synchronous>, transform_indices = @transform_1, window_bounds = array<i64: 128, 128>}, {pipeline_mode = #tpu.pipeline_mode<synchronous>, transform_indices = @transform_2, window_bounds = array<i64: 128, 128>}, {pipeline_mode = #tpu.pipeline_mode<synchronous>, transform_indices = @transform_3, window_bounds = array<i64: 1, 128>}, {pipeline_mode = #tpu.pipeline_mode<synchronous>, transform_indices = @transform_4, window_bounds = array<i64: 128, 128>}, {pipeline_mode = #tpu.pipeline_mode<synchronous>, transform_indices = @transform_5, window_bounds = array<i64: 1, 128>}, {transform_indices = @transform_6, window_bounds = array<i64: 8, 128>}, {transform_indices = @transform_7, window_bounds = array<i64: 8, 128>}, {transform_indices = @transform_8, window_bounds = array<i64: 8, 128>}]} {
    %c0 = arith.constant 0 : index
    %c0_0 = arith.constant 0 : index
    %0 = vector.load %arg1[%c0, %c0_0] : memref<8x128xi32, #tpu.memory_space<vmem>>, vector<8x128xi32>
    %c0_i32 = arith.constant 0 : i32
    %1 = vector.broadcast %c0_i32 : i32 to vector<8x128xi32>
    %2 = arith.cmpi ne, %0, %1 : vector<8x128xi32>
    %3 = arith.extui %2 : vector<8x128xi1> to vector<8x128xi32>
    %c0_1 = arith.constant 0 : index
    %c0_2 = arith.constant 0 : index
    %4 = vector.load %arg8[%c0_1, %c0_2] : memref<8x128xi32, #tpu.memory_space<vmem>>, vector<8x128xi32>
    tpu.vector_store %arg8[%c0_1, %c0_2], %3 {strides = array<i32>} : memref<8x128xi32, #tpu.memory_space<vmem>>, vector<8x128xi32>,
    %5 = tpu.iota {dimensions = array<i32: 2>} : vector<8x128x128xi32>
    %6 = vector.shape_cast %0 : vector<8x128xi32> to vector<8x128x1xi32>
    %7 = vector.broadcast %6 : vector<8x128x1xi32> to vector<8x128x128xi32>
    %8 = arith.cmpi eq, %5, %7 : vector<8x128x128xi32>
    %9 = arith.extui %8 : vector<8x128x128xi1> to vector<8x128x128xi32>
    %10 = arith.sitofp %9 : vector<8x128x128xi32> to vector<8x128x128xf32>
    %cst = arith.constant dense<0.000000e+00> : vector<8x128xf32>
    %11 = vector.multi_reduction <add>, %10, %cst [1] : vector<8x128x128xf32> to vector<8x128xf32>
    %12 = tpu.iota {dimensions = array<i32: 1>} : vector<8x128xi32>
    %c0_i32_3 = arith.constant 0 : i32
    %13 = vector.broadcast %c0_i32_3 : i32 to vector<8x128xi32>
    %14 = arith.cmpi eq, %12, %13 : vector<8x128xi32>
    %cst_4 = arith.constant 0.000000e+00 : f32
    %15 = vector.broadcast %cst_4 : f32 to vector<8x128xf32>
    %16 = arith.select %14, %15, %11 : vector<8x128xi1>, vector<8x128xf32>
    %17 = arith.truncf %16 : vector<8x128xf32> to vector<8x128xbf16>
    %c0_5 = arith.constant 0 : index
    %c0_6 = arith.constant 0 : index
    %18 = vector.load %arg2[%c0_5, %c0_6] : memref<128x128xbf16, #tpu.memory_space<vmem>>, vector<128x128xbf16>
    %cst_7 = arith.constant dense<0.000000e+00> : vector<8x128xf32>
    %19 = tpu.matmul %17, %18, %cst_7 {dimension_numbers = #tpu.dot_dimension_numbers<[1], [0], [0], [1], [0, 0, 1, 1], [], []>} : vector<8x128xbf16>, vector<128x128xbf16>, vector<8x128xf32> -> vector<8x128xf32>
    %20 = arith.extui %2 : vector<8x128xi1> to vector<8x128xi32>
    %21 = arith.sitofp %20 : vector<8x128xi32> to vector<8x128xf32>
    %cst_8 = arith.constant dense<0.000000e+00> : vector<8xf32>
    %22 = vector.multi_reduction <add>, %21, %cst_8 [1] : vector<8x128xf32> to vector<8xf32>
    %23 = vector.shape_cast %22 : vector<8xf32> to vector<8x1xf32>
    %cst_9 = arith.constant 1.000000e+00 : f32
    %24 = vector.broadcast %cst_9 : f32 to vector<8x1xf32>
    %25 = arith.maximumf %23, %24 : vector<8x1xf32>
    %26 = tpu.reciprocal %25 {approx = true} : vector<8x1xf32> -> vector<8x1xf32>
    %27 = vector.broadcast %26 : vector<8x1xf32> to vector<8x128xf32>
    %28 = arith.mulf %19, %27 : vector<8x128xf32>
    %c0_10 = arith.constant 0 : index
    %c0_11 = arith.constant 0 : index
    %29 = vector.load %arg3[%c0_10, %c0_11] : memref<128x128xf32, #tpu.memory_space<vmem>>, vector<128x128xf32>
    %cst_12 = arith.constant dense<0.000000e+00> : vector<8x128xf32>
    %30 = tpu.matmul %28, %29, %cst_12 {dimension_numbers = #tpu.dot_dimension_numbers<[1], [0], [0], [1], [0, 0, 1, 1], [], []>} : vector<8x128xf32>, vector<128x128xf32>, vector<8x128xf32> -> vector<8x128xf32>
    %c0_13 = arith.constant 0 : index
    %c0_14 = arith.constant 0 : index
    %31 = vector.load %arg4[%c0_13, %c0_14] : memref<1x128xf32, #tpu.memory_space<vmem>>, vector<1x128xf32>
    %32 = vector.broadcast %31 : vector<1x128xf32> to vector<8x128xf32>
    %33 = arith.addf %30, %32 : vector<8x128xf32>
    %34 = math.tanh %33 : vector<8x128xf32>
    %c0_15 = arith.constant 0 : index
    %c0_16 = arith.constant 0 : index
    %35 = vector.load %arg7[%c0_15, %c0_16] : memref<8x128xf32, #tpu.memory_space<vmem>>, vector<8x128xf32>
    tpu.vector_store %arg7[%c0_15, %c0_16], %34 {strides = array<i32>} : memref<8x128xf32, #tpu.memory_space<vmem>>, vector<8x128xf32>,
    %c0_17 = arith.constant 0 : index
    %c0_18 = arith.constant 0 : index
    %36 = vector.load %arg5[%c0_17, %c0_18] : memref<128x128xf32, #tpu.memory_space<vmem>>, vector<128x128xf32>
    %cst_19 = arith.constant dense<0.000000e+00> : vector<8x128xf32>
    %37 = tpu.matmul %34, %36, %cst_19 {dimension_numbers = #tpu.dot_dimension_numbers<[1], [0], [0], [1], [0, 0, 1, 1], [], []>} : vector<8x128xf32>, vector<128x128xf32>, vector<8x128xf32> -> vector<8x128xf32>
    %c0_20 = arith.constant 0 : index
    %c0_21 = arith.constant 0 : index
    %38 = vector.load %arg6[%c0_20, %c0_21] : memref<1x128xf32, #tpu.memory_space<vmem>>, vector<1x128xf32>
    %39 = vector.broadcast %38 : vector<1x128xf32> to vector<8x128xf32>
    %40 = arith.addf %37, %39 : vector<8x128xf32>
    %c0_22 = arith.constant 0 : index
    %c0_23 = arith.constant 0 : index
    %41 = vector.load %arg9[%c0_22, %c0_23] : memref<8x128xf32, #tpu.memory_space<vmem>>, vector<8x128xf32>
    tpu.vector_store %arg9[%c0_22, %c0_23], %40 {strides = array<i32>} : memref<8x128xf32, #tpu.memory_space<vmem>>, vector<8x128xf32>,
    return
  }
  func.func @transform_0(%arg0: i32) -> (i32, i32) {
    %c0_i32 = arith.constant 0 : i32
    %c0_i32_0 = arith.constant 0 : i32
    return %arg0, %c0_i32 : i32, i32
  }
  func.func @transform_1(%arg0: i32) -> (i32, i32) {
    %c0_i32 = arith.constant 0 : i32
    %c0_i32_0 = arith.constant 0 : i32
    %c0_i32_1 = arith.constant 0 : i32
    return %c0_i32, %c0_i32_0 : i32, i32
  }
  func.func @transform_2(%arg0: i32) -> (i32, i32) {
    %c0_i32 = arith.constant 0 : i32
    %c0_i32_0 = arith.constant 0 : i32
    %c0_i32_1 = arith.constant 0 : i32
    return %c0_i32, %c0_i32_0 : i32, i32
  }
  func.func @transform_3(%arg0: i32) -> (i32, i32) {
    %c0_i32 = arith.constant 0 : i32
    %c0_i32_0 = arith.constant 0 : i32
    %c0_i32_1 = arith.constant 0 : i32
    return %c0_i32, %c0_i32_0 : i32, i32
  }
  func.func @transform_4(%arg0: i32) -> (i32, i32) {
    %c0_i32 = arith.constant 0 : i32
    %c0_i32_0 = arith.constant 0 : i32
    %c0_i32_1 = arith.constant 0 : i32
    return %c0_i32, %c0_i32_0 : i32, i32
  }
  func.func @transform_5(%arg0: i32) -> (i32, i32) {
    %c0_i32 = arith.constant 0 : i32
    %c0_i32_0 = arith.constant 0 : i32
    %c0_i32_1 = arith.constant 0 : i32
    return %c0_i32, %c0_i32_0 : i32, i32
  }
  func.func @transform_6(%arg0: i32) -> (i32, i32) {
    %c0_i32 = arith.constant 0 : i32
    %c0_i32_0 = arith.constant 0 : i32
    return %arg0, %c0_i32 : i32, i32
  }
  func.func @transform_7(%arg0: i32) -> (i32, i32) {
    %c0_i32 = arith.constant 0 : i32
    %c0_i32_0 = arith.constant 0 : i32
    return %arg0, %c0_i32 : i32, i32
  }
  func.func @transform_8(%arg0: i32) -> (i32, i32) {
    %c0_i32 = arith.constant 0 : i32
    %c0_i32_0 = arith.constant 0 : i32
    return %arg0, %c0_i32 : i32, i32
  }
}

</mosaic_0001>

<bundles_post_ra>
// kernel: variational_encode.1
= control target key start
LH: loop header
LB: loop body
LE: loop exit
PB: predicated region body
PF: predicated region fallthrough
CT: control target
= control target key end

     0   :  { %14 = vsyncpa [#allocation3], 0  ;;  %v32_v0 = vlaneseq  ;;  %s2856_s0 = inlined_call_operand.vmem [shape: s32[8,128], index: 0, kind: input, shape index: {}]   ;;  %s2857_s1 = inlined_call_operand.vmem [shape: bf16[128,128], index: 1, kind: input, shape index: {}]   ;;  %s2858_s2 = inlined_call_operand.vmem [shape: f32[128,128], index: 2, kind: input, shape index: {}]   ;;  %s2859_s3 = inlined_call_operand.vmem [shape: f32[1,128], index: 3, kind: input, shape index: {}]   ;;  %s2860_s4 = inlined_call_operand.vmem [shape: f32[128,128], index: 4, kind: input, shape index: {}]   ;;  %s2861_s5 = inlined_call_operand.vmem [shape: f32[1,128], index: 5, kind: input, shape index: {}]   ;;  %s2862_s6 = inlined_call_operand.hbm [shape: f32[8,128], index: 6, kind: output, shape index: {0}]   ;;  %s2863_s7 = inlined_call_operand.hbm [shape: s32[8,128], index: 7, kind: output, shape index: {1}]   ;;  %s2864_s8 = inlined_call_operand.vmem [shape: f32[8,128], index: 8, kind: output, shape index: {2}]  }
   0x1   :  { %15 = vsyncpa [#allocation5], 0  ;;  %v1982_v5 = vld [vmem:[%s2856_s0] sm:$0xff]  ;;  %v1915_v32 = vmov 0.0   ;;  %s1916_s17 = smov [#allocation2]   ;;  %s1561_s21 = sshll.u32 %s2862_s6, 4  ;;  %s1562_s21 = int_to_ptr.hbm [resolvable:$true] %s1561_s21 }
   0x2   :  { %v1965_v1 = vshrl.u32 %v32_v0, 7  ;;  %v1985_v6 = vperm.slane %v1982_v5, 0  ;;  %v1997_v9 = vperm.slane %v1982_v5, 2  ;;  %v2015_v12 = vperm.slane %v1982_v5, 3  ;;  %s1559_s18 = sshll.u32 %s1916_s17, 4  ;;  %s1560_s18 = int_to_ptr.vmem [resolvable:$true] %s1559_s18 }
   0x3   :  { %v2027_v15 = vperm.slane %v1982_v5, 5  ;;  %v2033_v16 = vperm.slane %v1982_v5, 6  ;;  %v2048_v19 = vperm.slane %v1982_v5, 1  ;;  %v2074_v23 = vand.u32 127, %v32_v0 }
   0x4   :  { %v1968_v2 = vadd.s32 32, %v1965_v1  ;;  %v1971_v3 = vadd.s32 16, %v1965_v1  ;;  %v1974_v4 = vadd.s32 8, %v1965_v1  ;;  %v1991_v7 = vadd.s32 40, %v1965_v1 }
   0x5   :  { %v1994_v8 = vadd.s32 24, %v1965_v1  ;;  %v2006_v10 = vadd.s32 56, %v1965_v1  ;;  %v2009_v11 = vadd.s32 48, %v1965_v1  ;;  %v2021_v13 = vadd.s32 80, %v1965_v1 }
   0x6   :  { %1772 = vset.pattern.permute.xlu2 %v1968_v2  ;;  %1770 = vset.pattern.permute.xlu1 %v1971_v3  ;;  %v2024_v14 = vadd.s32 72, %v1965_v1  ;;  %v2039_v17 = vadd.s32 96, %v1965_v1  ;;  %v2042_v18 = vadd.s32 88, %v1965_v1  ;;  %v2054_v20 = vadd.s32 120, %v1965_v1 }
   0x7   :  { %1769 = vset.pattern.permute.xlu0 %v1974_v4  ;;  %v2057_v21 = vadd.s32 112, %v1965_v1  ;;  %v2094_v29 = vadd.s32 64, %v1965_v1  ;;  %v2148_v54 = vadd.s32 104, %v1965_v1 }
   0xe   :  { %63 = vperm.xlu2 %1772, %v1985_v6   ;;  %51 = vperm.xlu1 %1770, %v1985_v6  }
   0xf   :  { %45 = vperm.xlu0 %1769, %v1985_v6  }
  0x16   :  { %1773 = vset.pattern.permute.xlu2 %v1991_v7  ;;  %1771 = vset.pattern.permute.xlu1 %v1994_v8 }
  0x17   :  { %239 = vperm.xlu0 %1769, %v1997_v9  }
  0x1e   :  { %69 = vperm.xlu2 %1773, %v1985_v6   ;;  %57 = vperm.xlu1 %1771, %v1985_v6  }
  0x1f   :  { %1796 = vset.pattern.permute.xlu0 %v1965_v1 }
  0x26   :  { %1775 = vset.pattern.permute.xlu2 %v2006_v10  ;;  %1774 = vset.pattern.permute.xlu1 %v2009_v11 }
  0x27   :  { %39 = vperm.xlu0 %1796, %v1985_v6  }
  0x2e   :  { %81 = vperm.xlu2 %1775, %v1985_v6   ;;  %75 = vperm.xlu1 %1774, %v1985_v6  }
  0x2f   :  { %330 = vperm.xlu0 %1796, %v2015_v12  }
  0x36   :  { %1777 = vset.pattern.permute.xlu2 %v2021_v13  ;;  %1776 = vset.pattern.permute.xlu1 %v2024_v14 }
  0x37   :  { %524 = vperm.xlu0 %1796, %v2027_v15  }
  0x3e   :  { %99 = vperm.xlu2 %1777, %v1985_v6   ;;  %93 = vperm.xlu1 %1776, %v1985_v6  }
  0x3f   :  { %621 = vperm.xlu0 %1796, %v2033_v16  }
  0x46   :  { %1779 = vset.pattern.permute.xlu2 %v2039_v17  ;;  %1778 = vset.pattern.permute.xlu1 %v2042_v18 }
  0x47   :  { %1812 = vset.pattern.permute.xlu0 %v1971_v3 }
  0x4e   :  { %111 = vperm.xlu2 %1779, %v1985_v6   ;;  %105 = vperm.xlu1 %1778, %v1985_v6  }
  0x4f   :  { %148 = vperm.xlu0 %1812, %v2048_v19  }
  0x56   :  { %1781 = vset.pattern.permute.xlu2 %v2054_v20  ;;  %1780 = vset.pattern.permute.xlu1 %v2057_v21 }
  0x57   :  { %536 = vperm.xlu0 %1812, %v2027_v15  }
  0x5e   :  { %129 = vperm.xlu2 %1781, %v1985_v6   ;;  %123 = vperm.xlu1 %1780, %v1985_v6  }
  0x5f   :  { %1818 = vset.pattern.permute.xlu0 %v1968_v2 }
  0x66   :  { %1783 = vset.pattern.permute.xlu2 %v1974_v4  ;;  %1782 = vset.pattern.permute.xlu1 %v1965_v1 }
  0x67   :  { %354 = vperm.xlu0 %1818, %v2015_v12  }
  0x68   :  { %v64_v22 = vpop.permute.xlu2 %63 }
  0x69   :  { %vm814_vm8 = vcmp.eq.s32.totalorder %v2074_v23, %v64_v22 }
  0x6a   :  { %v1594_v42 = vsel %vm814_vm8, 1.0, %v1915_v32 }
  0x6e   :  { %142 = vperm.xlu2 %1783, %v2048_v19   ;;  %136 = vperm.xlu1 %1782, %v2048_v19  }
  0x6f   :  { %1821 = vset.pattern.permute.xlu0 %v1991_v7 }
  0x76   :  { %1785 = vset.pattern.permute.xlu2 %v1968_v2  ;;  %1784 = vset.pattern.permute.xlu1 %v1994_v8 }
  0x77   :  { %360 = vperm.xlu0 %1821, %v2015_v12  }
  0x78   :  { %v70_v24 = vpop.permute.xlu2 %69 }
  0x79   :  { %vm815_vm0 = vcmp.eq.s32.totalorder %v2074_v23, %v70_v24 }
  0x7a   :  { %v1595_v44 = vsel %vm815_vm0, 1.0, %v1915_v32 }
  0x7e   :  { %160 = vperm.xlu2 %1785, %v2048_v19   ;;  %154 = vperm.xlu1 %1784, %v2048_v19  }
  0x7f   :  { %1822 = vset.pattern.permute.xlu0 %v2009_v11 }
  0x80   :  { %v52_v28 = vpop.permute.xlu1 %51 }
  0x81   :  { %v46_v25 = vpop.permute.xlu0 %45  ;;  %vm812_vm5 = vcmp.eq.s32.totalorder %v2074_v23, %v52_v28 }
  0x82   :  { %vm811_vm1 = vcmp.eq.s32.totalorder %v2074_v23, %v46_v25  ;;  %v1592_v37 = vsel %vm812_vm5, 1.0, %v1915_v32 }
  0x83   :  { %v1591_v33 = vsel %vm811_vm1, 1.0, %v1915_v32 }
  0x86   :  { %1787 = vset.pattern.permute.xlu2 %v2009_v11  ;;  %1786 = vset.pattern.permute.xlu1 %v1991_v7 }
  0x87   :  { %269 = vperm.xlu0 %1822, %v1997_v9  }
  0x88   :  { %v82_v26 = vpop.permute.xlu2 %81 }
  0x89   :  { %v2085_v27 = vpop.permute.xlu0 %239  ;;  %vm817_vm2 = vcmp.eq.s32.totalorder %v2074_v23, %v82_v26 }
  0x8a   :  { %vm843_vm3 = vcmp.eq.s32.totalorder %v2074_v23, %v2085_v27  ;;  %v1597_v48 = vsel %vm817_vm2, 1.0, %v1915_v32 }
  0x8e   :  { %172 = vperm.xlu2 %1787, %v2048_v19   ;;  %166 = vperm.xlu1 %1786, %v2048_v19  }
  0x8f   :  { %366 = vperm.xlu0 %1822, %v2015_v12  }
  0x90   :  { %v58_v30 = vpop.permute.xlu1 %57 }
  0x91   :  { %vm813_vm7 = vcmp.eq.s32.totalorder %v2074_v23, %v58_v30 }
  0x92   :  { %v1593_v39 = vsel %vm813_vm7, 1.0, %v1915_v32 }
  0x96   :  { %1789 = vset.pattern.permute.xlu2 %v2024_v14  ;;  %1788 = vset.pattern.permute.xlu1 %v2094_v29 }
  0x97   :  { %1825 = vset.pattern.permute.xlu0 %v2006_v10 }
  0x98   :  { %v2099_v31 = vpop.permute.xlu2 %99 }
  0x99   :  { %v40_v34 = vpop.permute.xlu0 %39  ;;  %vm820_vm4 = vcmp.eq.s32.totalorder %v2074_v23, %v2099_v31 }
  0x9a   :  { %vm810_vm6 = vcmp.eq.s32.totalorder %v2074_v23, %v40_v34 }
  0x9b   :  { %v1590_v35 = vsel %vm810_vm6, 1.0, %v1915_v32 }
  0x9c   :  { %v1194_v36 = vadd.f32 %v1591_v33, %v1590_v35 }
  0x9e   :  { %v1195_v38 = vadd.f32 %v1592_v37, %v1194_v36  ;;  %190 = vperm.xlu2 %1789, %v2048_v19   ;;  %184 = vperm.xlu1 %1788, %v2048_v19  }
  0x9f   :  { %178 = vperm.xlu0 %1825, %v2048_v19  }
  0xa0   :  { %v1196_v40 = vadd.f32 %v1593_v39, %v1195_v38  ;;  %v76_v41 = vpop.permute.xlu1 %75 }
  0xa1   :  { %vm816_vm9 = vcmp.eq.s32.totalorder %v2074_v23, %v76_v41  ;;  %v2128_v49 = vpop.permute.xlu0 %330 }
  0xa2   :  { %v1197_v43 = vadd.f32 %v1594_v42, %v1196_v40  ;;  %v1596_v46 = vsel %vm816_vm9, 1.0, %v1915_v32  ;;  %vm858_vm10 = vcmp.eq.s32.totalorder %v2074_v23, %v2128_v49 }
  0xa4   :  { %v1198_v45 = vadd.f32 %v1595_v44, %v1197_v43 }
  0xa6   :  { %v1199_v47 = vadd.f32 %v1596_v46, %v1198_v45  ;;  %1791 = vset.pattern.permute.xlu2 %v2042_v18  ;;  %1790 = vset.pattern.permute.xlu1 %v2021_v13 }
  0xa7   :  { %372 = vperm.xlu0 %1825, %v2015_v12  }
  0xa8   :  { %v2130_v50 = vpop.permute.xlu2 %111  ;;  %v2134_v51 = vadd.f32 %v1597_v48, %v1199_v47 }
  0xa9   :  { %vm822_vm11 = vcmp.eq.s32.totalorder %v2074_v23, %v2130_v50  ;;  %v2145_v53 = vpop.permute.xlu0 %524 }
  0xaa   :  { %vm890_vm13 = vcmp.eq.s32.totalorder %v2074_v23, %v2145_v53  ;;  %v1602_v31 = vsel %vm822_vm11, 1.0, %v1915_v32 }
  0xae   :  { %202 = vperm.xlu2 %1791, %v2048_v19   ;;  %196 = vperm.xlu1 %1790, %v2048_v19  }
  0xaf   :  { %1828 = vset.pattern.permute.xlu0 %v2094_v29 }
  0xb0   :  { %v2141_v52 = vpop.permute.xlu1 %93 }
  0xb1   :  { %vm819_vm12 = vcmp.eq.s32.totalorder %v2074_v23, %v2141_v52  ;;  %v2159_v56 = vpop.permute.xlu0 %621 }
  0xb6   :  { %1793 = vset.pattern.permute.xlu2 %v2057_v21  ;;  %1792 = vset.pattern.permute.xlu1 %v2148_v54 }
  0xb7   :  { %87 = vperm.xlu0 %1828, %v1985_v6  }
  0xb8   :  { %v2155_v55 = vpop.permute.xlu2 %129 }
  0xb9   :  { %vm825_vm14 = vcmp.eq.s32.totalorder %v2074_v23, %v2155_v55 }
  0xbe   :  { %220 = vperm.xlu2 %1793, %v2048_v19   ;;  %214 = vperm.xlu1 %1792, %v2048_v19  }
  0xbf   :  { %378 = vperm.xlu0 %1828, %v2015_v12  }
  0xc0   :  { %v2166_v57 = vpop.permute.xlu1 %105 }
  0xc1   :  { %vm821_vm0 = vcmp.eq.s32.totalorder %v2074_v23, %v2166_v57  ;;  %v149_v58 = vpop.permute.xlu0 %148 }
  0xc2   :  { %vm828_vm1 = vcmp.eq.s32.totalorder %v2074_v23, %v149_v58 }
  0xc3   :  { %v1608_v25 = vsel %vm828_vm1, 1.0, %v1915_v32 }
  0xc6   :  { %1795 = vset.pattern.permute.xlu2 %v1965_v1  ;;  %1794 = vset.pattern.permute.xlu1 %v2054_v20 }
  0xc7   :  { %1833 = vset.pattern.permute.xlu0 %v2024_v14 }
  0xc8   :  { %v143_v59 = vpop.permute.xlu2 %142 }
  0xc9   :  { %vm827_vm2 = vcmp.eq.s32.totalorder %v2074_v23, %v143_v59  ;;  %v2175_v60 = vpop.permute.xlu0 %536 }
  0xca   :  { %vm892_vm5 = vcmp.eq.s32.totalorder %v2074_v23, %v2175_v60  ;;  %v1607_v22 = vsel %vm827_vm2, 1.0, %v1915_v32 }
  0xce   :  { %233 = vperm.xlu2 %1795, %v1997_v9   ;;  %226 = vperm.xlu1 %1794, %v2048_v19  }
  0xcf   :  { %384 = vperm.xlu0 %1833, %v2015_v12  }
  0xd0   :  { %v2182_v61 = vpop.permute.xlu1 %123 }
  0xd1   :  { %vm824_vm6 = vcmp.eq.s32.totalorder %v2074_v23, %v2182_v61 }
  0xd6   :  { %1798 = vset.pattern.permute.xlu2 %v1994_v8  ;;  %1797 = vset.pattern.permute.xlu1 %v1971_v3 }
  0xd7   :  { %1836 = vset.pattern.permute.xlu0 %v2021_v13 }
  0xd8   :  { %v161_v62 = vpop.permute.xlu2 %160 }
  0xd9   :  { %vm830_vm7 = vcmp.eq.s32.totalorder %v2074_v23, %v161_v62  ;;  %v2190_v63 = vpop.permute.xlu0 %354 }
  0xda   :  { %v1610_v37 = vsel %vm830_vm7, 1.0, %v1915_v32 }
  0xde   :  { %251 = vperm.xlu2 %1798, %v1997_v9   ;;  %245 = vperm.xlu1 %1797, %v1997_v9  }
  0xdf   :  { %390 = vperm.xlu0 %1836, %v2015_v12  }
  0xe0   :  { %v137_v0 = vpop.permute.xlu1 %136 }
  0xe1   :  { %vm826_vm9 = vcmp.eq.s32.totalorder %v2074_v23, %v137_v0 }
  0xe2   :  { %v1606_v24 = vsel %vm826_vm9, 1.0, %v1915_v32 }
  0xe3   :  { %v1215_v26 = vadd.f32 %v1607_v22, %v1606_v24 }
  0xe5   :  { %v1216_v28 = vadd.f32 %v1608_v25, %v1215_v26 }
  0xe6   :  { %1800 = vset.pattern.permute.xlu2 %v1991_v7  ;;  %1799 = vset.pattern.permute.xlu1 %v1968_v2 }
  0xe7   :  { %1837 = vset.pattern.permute.xlu0 %v2042_v18 }
  0xe8   :  { %v173_v30 = vpop.permute.xlu2 %172 }
  0xe9   :  { %vm832_vm15 = vcmp.eq.s32.totalorder %v2074_v23, %v173_v30  ;;  %v2209_v33 = vpop.permute.xlu0 %360 }
  0xea   :  { %v1612_v45 = vsel %vm832_vm15, 1.0, %v1915_v32 }
  0xee   :  { %263 = vperm.xlu2 %1800, %v1997_v9   ;;  %257 = vperm.xlu1 %1799, %v1997_v9  }
  0xef   :  { %299 = vperm.xlu0 %1837, %v1997_v9  }
  0xf0   :  { %v155_v34 = vpop.permute.xlu1 %154 }
  0xf1   :  { %vm829_vm1 = vcmp.eq.s32.totalorder %v2074_v23, %v155_v34 }
  0xf2   :  { %v1609_v35 = vsel %vm829_vm1, 1.0, %v1915_v32 }
  0xf3   :  { %v1217_v36 = vadd.f32 %v1609_v35, %v1216_v28 }
  0xf5   :  { %v1218_v38 = vadd.f32 %v1610_v37, %v1217_v36 }
  0xf6   :  { %1802 = vset.pattern.permute.xlu2 %v2094_v29  ;;  %1801 = vset.pattern.permute.xlu1 %v2006_v10 }
  0xf7   :  { %396 = vperm.xlu0 %1837, %v2015_v12  }
  0xf8   :  { %v191_v39 = vpop.permute.xlu2 %190 }
  0xf9   :  { %v2224_v40 = vpop.permute.xlu0 %269  ;;  %vm835_vm9 = vcmp.eq.s32.totalorder %v2074_v23, %v191_v39 }
  0xfa   :  { %vm848_vm1 = vcmp.eq.s32.totalorder %v2074_v23, %v2224_v40  ;;  %v1615_v22 = vsel %vm835_vm9, 1.0, %v1915_v32 }
  0xfe   :  { %281 = vperm.xlu2 %1802, %v1997_v9   ;;  %275 = vperm.xlu1 %1801, %v1997_v9  }
  0xff   :  { %1840 = vset.pattern.permute.xlu0 %v2039_v17 }
 0x100   :  { %v167_v41 = vpop.permute.xlu1 %166 }
 0x101   :  { %vm831_vm7 = vcmp.eq.s32.totalorder %v2074_v23, %v167_v41  ;;  %v2233_v42 = vpop.permute.xlu0 %366 }
 0x102   :  { %v1611_v43 = vsel %vm831_vm7, 1.0, %v1915_v32  ;;  %vm864_vm2 = vcmp.eq.s32.totalorder %v2074_v23, %v2233_v42 }
 0x103   :  { %v1219_v44 = vadd.f32 %v1611_v43, %v1218_v38  ;;  %v1644_v60 = vsel %vm864_vm2, 1.0, %v1915_v32 }
 0x105   :  { %v1220_v46 = vadd.f32 %v1612_v45, %v1219_v44  ;;  %v1599_v45 = vsel %vm819_vm12, 1.0, %v1915_v32 }
 0x106   :  { %1804 = vset.pattern.permute.xlu2 %v2021_v13  ;;  %1803 = vset.pattern.permute.xlu1 %v2024_v14 }
 0x107   :  { %208 = vperm.xlu0 %1840, %v2048_v19  }
 0x108   :  { %v203_v47 = vpop.permute.xlu2 %202 }
 0x109   :  { %vm837_vm8 = vcmp.eq.s32.totalorder %v2074_v23, %v203_v47 }
 0x10a   :  { %v1617_v35 = vsel %vm837_vm8, 1.0, %v1915_v32 }
 0x10e   :  { %293 = vperm.xlu2 %1804, %v1997_v9   ;;  %287 = vperm.xlu1 %1803, %v1997_v9  }
 0x10f   :  { %402 = vperm.xlu0 %1840, %v2015_v12  }
 0x110   :  { %v185_v48 = vpop.permute.xlu1 %184 }
 0x111   :  { %vm834_vm7 = vcmp.eq.s32.totalorder %v2074_v23, %v185_v48  ;;  %v179_v58 = vpop.permute.xlu0 %178 }
 0x112   :  { %vm833_vm15 = vcmp.eq.s32.totalorder %v2074_v23, %v179_v58  ;;  %v1614_v19 = vsel %vm834_vm7, 1.0, %v1915_v32 }
 0x113   :  { %v1613_v59 = vsel %vm833_vm15, 1.0, %v1915_v32 }
 0x114   :  { %v1221_v62 = vadd.f32 %v1613_v59, %v1220_v46  ;;  %v1600_v46 = vsel %vm820_vm4, 1.0, %v1915_v32  ;;  %v2322_v59 = vperm.slane %v1982_v5, 4 }
 0x116   :  { %v1222_v0 = vadd.f32 %v1614_v19, %v1221_v62  ;;  %1806 = vset.pattern.permute.xlu2 %v2148_v54  ;;  %1805 = vset.pattern.permute.xlu1 %v2039_v17 }
 0x117   :  { %1843 = vset.pattern.permute.xlu0 %v2148_v54 }
 0x118   :  { %v1223_v24 = vadd.f32 %v1615_v22, %v1222_v0  ;;  %v2258_v25 = vpop.permute.xlu2 %220 }
 0x119   :  { %v2260_v26 = vpop.permute.xlu0 %372  ;;  %vm840_vm15 = vcmp.eq.s32.totalorder %v2074_v23, %v2258_v25 }
 0x11e   :  { %311 = vperm.xlu2 %1806, %v1997_v9   ;;  %305 = vperm.xlu1 %1805, %v1997_v9  }
 0x11f   :  { %117 = vperm.xlu0 %1843, %v1985_v6   ;;  %v1623_v6 = vsel %vm843_vm3, 1.0, %v1915_v32 }
 0x120   :  { %v197_v28 = vpop.permute.xlu1 %196 }
 0x121   :  { %vm836_vm9 = vcmp.eq.s32.totalorder %v2074_v23, %v197_v28 }
 0x122   :  { %v1616_v30 = vsel %vm836_vm9, 1.0, %v1915_v32 }
 0x123   :  { %v1224_v34 = vadd.f32 %v1616_v30, %v1223_v24 }
 0x125   :  { %v2274_v36 = vadd.f32 %v1617_v35, %v1224_v34  ;;  %v2352_v35 = vperm.slane %v1982_v5, 7 }
 0x126   :  { %1808 = vset.pattern.permute.xlu2 %v2054_v20  ;;  %1807 = vset.pattern.permute.xlu1 %v2057_v21 }
 0x127   :  { %408 = vperm.xlu0 %1843, %v2015_v12  }
 0x128   :  { %v234_v37 = vpop.permute.xlu2 %233 }
 0x129   :  { %v88_v38 = vpop.permute.xlu0 %87  ;;  %vm842_vm9 = vcmp.eq.s32.totalorder %v2074_v23, %v234_v37 }
 0x12a   :  { %vm818_vm7 = vcmp.eq.s32.totalorder %v2074_v23, %v88_v38  ;;  %v1622_v39 = vsel %vm842_vm9, 1.0, %v1915_v32 }
 0x12b   :  { %v1598_v41 = vsel %vm818_vm7, 1.0, %v1915_v32  ;;  %v1236_v43 = vadd.f32 %v1623_v6, %v1622_v39  ;;  %v1628_v39 = vsel %vm848_vm1, 1.0, %v1915_v32 }
 0x12c   :  { %v1201_v44 = vadd.f32 %v1598_v41, %v2134_v51  ;;  %v1601_v51 = vsel %vm821_vm0, 1.0, %v1915_v32 }
 0x12e   :  { %v1202_v27 = vadd.f32 %v1599_v45, %v1201_v44  ;;  %323 = vperm.xlu2 %1808, %v1997_v9   ;;  %317 = vperm.xlu1 %1807, %v1997_v9  }
 0x12f   :  { %1848 = vset.pattern.permute.xlu0 %v2057_v21 }
 0x130   :  { %v1203_v47 = vadd.f32 %v1600_v46, %v1202_v27  ;;  %v2299_v48 = vpop.permute.xlu1 %214 }
 0x131   :  { %vm839_vm3 = vcmp.eq.s32.totalorder %v2074_v23, %v2299_v48  ;;  %v2307_v52 = vpop.permute.xlu0 %378 }
 0x132   :  { %v1204_v9 = vadd.f32 %v1601_v51, %v1203_v47  ;;  %vm866_vm4 = vcmp.eq.s32.totalorder %v2074_v23, %v2307_v52 }
 0x134   :  { %v2315_v58 = vadd.f32 %v1602_v31, %v1204_v9 }
 0x136   :  { %1810 = vset.pattern.permute.xlu2 %v1965_v1  ;;  %1809 = vset.pattern.permute.xlu1 %v1974_v4 }
 0x137   :  { %414 = vperm.xlu0 %1848, %v2015_v12  }
 0x138   :  { %v252_v57 = vpop.permute.xlu2 %251 }
 0x139   :  { %vm845_vm12 = vcmp.eq.s32.totalorder %v2074_v23, %v252_v57 }
 0x13a   :  { %v1625_v30 = vsel %vm845_vm12, 1.0, %v1915_v32 }
 0x13e   :  { %427 = vperm.xlu2 %1810, %v2322_v59   ;;  %336 = vperm.xlu1 %1809, %v2015_v12  }
 0x13f   :  { %1851 = vset.pattern.permute.xlu0 %v2054_v20 }
 0x140   :  { %v2327_v50 = vpop.permute.xlu1 %226 }
 0x141   :  { %vm841_vm11 = vcmp.eq.s32.totalorder %v2074_v23, %v2327_v50  ;;  %v2331_v62 = vpop.permute.xlu0 %384 }
 0x142   :  { %vm867_vm0 = vcmp.eq.s32.totalorder %v2074_v23, %v2331_v62 }
 0x146   :  { %1811 = vset.pattern.permute.xlu2 %v1971_v3  ;;  %433 = vperm.xlu1 %1809, %v2322_v59  }
 0x147   :  { %420 = vperm.xlu0 %1851, %v2015_v12  }
 0x148   :  { %v264_v19 = vpop.permute.xlu2 %263 }
 0x149   :  { %vm847_vm8 = vcmp.eq.s32.totalorder %v2074_v23, %v264_v19  ;;  %v1619_v19 = vsel %vm839_vm3, 1.0, %v1915_v32 }
 0x14a   :  { %v1627_v41 = vsel %vm847_vm8, 1.0, %v1915_v32 }
 0x14e   :  { %342 = vperm.xlu2 %1811, %v2015_v12   ;;  %530 = vperm.xlu1 %1809, %v2027_v15  }
 0x14f   :  { %614 = vperm.xlu0 %1851, %v2027_v15  }
 0x150   :  { %v246_v0 = vpop.permute.xlu1 %245 }
 0x151   :  { %vm844_vm7 = vcmp.eq.s32.totalorder %v2074_v23, %v246_v0  ;;  %v2343_v22 = vpop.permute.xlu0 %390 }
 0x152   :  { %v1624_v24 = vsel %vm844_vm7, 1.0, %v1915_v32 }
 0x153   :  { %v1237_v28 = vadd.f32 %v1624_v24, %v1236_v43  ;;  %v1620_v24 = vsel %vm840_vm15, 1.0, %v1915_v32 }
 0x155   :  { %v1238_v34 = vadd.f32 %v1625_v30, %v1237_v28 }
 0x156   :  { %439 = vperm.xlu2 %1811, %v2322_v59   ;;  %627 = vperm.xlu1 %1809, %v2033_v16  }
 0x157   :  { %808 = vperm.xlu0 %1851, %v2352_v35  }
 0x158   :  { %v282_v6 = vpop.permute.xlu2 %281 }
 0x159   :  { %vm850_vm7 = vcmp.eq.s32.totalorder %v2074_v23, %v282_v6 }
 0x15e   :  { %1813 = vset.pattern.permute.xlu2 %v1994_v8  ;;  %1814 = vset.pattern.permute.xlu1 %v1965_v1 }
 0x160   :  { %v258_v37 = vpop.permute.xlu1 %257 }
 0x161   :  { %vm846_vm12 = vcmp.eq.s32.totalorder %v2074_v23, %v258_v37  ;;  %v300_v44 = vpop.permute.xlu0 %299 }
 0x162   :  { %v1626_v38 = vsel %vm846_vm12, 1.0, %v1915_v32 }
 0x163   :  { %v1239_v5 = vadd.f32 %v1626_v38, %v1238_v34 }
 0x165   :  { %v1240_v43 = vadd.f32 %v1627_v41, %v1239_v5 }
 0x166   :  { %348 = vperm.xlu2 %1813, %v2015_v12   ;;  %718 = vperm.xlu1 %1814, %v2352_v35   ;;  %v1630_v12 = vsel %vm850_vm7, 1.0, %v1915_v32 }
 0x167   :  { %v1241_v1 = vadd.f32 %v1628_v39, %v1240_v43 }
 0x168   :  { %v294_v45 = vpop.permute.xlu2 %293 }
 0x169   :  { %vm852_vm12 = vcmp.eq.s32.totalorder %v2074_v23, %v294_v45  ;;  %v2374_v40 = vpop.permute.xlu0 %396 }
 0x16a   :  { %v1632_v25 = vsel %vm852_vm12, 1.0, %v1915_v32 }
 0x16e   :  { %1815 = vset.pattern.permute.xlu2 %v1974_v4  ;;  %1816 = vset.pattern.permute.xlu1 %v1994_v8 }
 0x170   :  { %v276_v27 = vpop.permute.xlu1 %275 }
 0x171   :  { %vm849_vm1 = vcmp.eq.s32.totalorder %v2074_v23, %v276_v27 }
 0x172   :  { %v1629_v46 = vsel %vm849_vm1, 1.0, %v1915_v32 }
 0x173   :  { %v1242_v47 = vadd.f32 %v1629_v46, %v1241_v1 }
 0x175   :  { %v1243_v51 = vadd.f32 %v1630_v12, %v1242_v47  ;;  %v1604_v12 = vsel %vm824_vm6, 1.0, %v1915_v32 }
 0x176   :  { %724 = vperm.xlu2 %1815, %v2352_v35   ;;  %445 = vperm.xlu1 %1816, %v2322_v59  }
 0x178   :  { %v312_v4 = vpop.permute.xlu2 %311 }
 0x179   :  { %v209_v9 = vpop.permute.xlu0 %208  ;;  %vm855_vm8 = vcmp.eq.s32.totalorder %v2074_v23, %v312_v4 }
 0x17a   :  { %vm838_vm9 = vcmp.eq.s32.totalorder %v2074_v23, %v209_v9  ;;  %v1635_v46 = vsel %vm855_vm8, 1.0, %v1915_v32  ;;  %vm1373_vm8 = vcmask 1042434  }
 0x17b   :  { %v1618_v31 = vsel %vm838_vm9, 1.0, %v1915_v32  ;;  %vm853_vm9 = vcmp.eq.s32.totalorder %v2074_v23, %v300_v44 }
 0x17c   :  { %v1226_v57 = vadd.f32 %v1618_v31, %v2274_v36  ;;  %v1621_v36 = vsel %vm841_vm11, 1.0, %v1915_v32  ;;  %v1633_v6 = vsel %vm853_vm9, 1.0, %v1915_v32  ;;  %v1605_v31 = vsel %vm825_vm14, 1.0, %v1915_v32 }
 0x17d   :  { %vm1371_vm14 = vcmask 1041409  }
 0x17e   :  { %v1227_v0 = vadd.f32 %v1619_v19, %v1226_v57  ;;  %1817 = vset.pattern.permute.xlu2 %v1971_v3  ;;  %542 = vperm.xlu1 %1816, %v2027_v15  }
 0x180   :  { %v1228_v28 = vadd.f32 %v1620_v24, %v1227_v0  ;;  %v288_v30 = vpop.permute.xlu1 %287 }
 0x181   :  { %vm851_vm3 = vcmp.eq.s32.totalorder %v2074_v23, %v288_v30  ;;  %v2410_v50 = vpop.permute.xlu0 %402 }
 0x182   :  { %v1229_v48 = vadd.f32 %v1621_v36, %v1228_v28  ;;  %v1631_v3 = vsel %vm851_vm3, 1.0, %v1915_v32 }
 0x183   :  { %v1244_v34 = vadd.f32 %v1631_v3, %v1243_v51 }
 0x184   :  { %v1230_v39 = vrot.slane %v1229_v48, 4 }
 0x185   :  { %v1245_v37 = vadd.f32 %v1632_v25, %v1244_v34 }
 0x186   :  { %633 = vperm.xlu2 %1817, %v2033_v16   ;;  %1819 = vset.pattern.permute.xlu1 %v1968_v2  ;;  %v1231_v27 = vadd.f32 %v1230_v39, %v1229_v48 }
 0x187   :  { %v1246_v38 = vadd.f32 %v1633_v6, %v1245_v37 }
 0x188   :  { %v324_v5 = vpop.permute.xlu2 %323  ;;  %v1232_v4 = vrot.slane %v1231_v27, 2 }
 0x189   :  { %vm857_vm15 = vcmp.eq.s32.totalorder %v2074_v23, %v324_v5  ;;  %v1638_v5 = vsel %vm858_vm10, 1.0, %v1915_v32 }
 0x18a   :  { %v1233_v0 = vadd.f32 %v1232_v4, %v1231_v27  ;;  %v1637_v6 = vsel %vm857_vm15, 1.0, %v1915_v32 }
 0x18e   :  { %730 = vperm.xlu2 %1817, %v2352_v35   ;;  %451 = vperm.xlu1 %1819, %v2322_v59  }
 0x190   :  { %v306_v41 = vpop.permute.xlu1 %305 }
 0x191   :  { %vm854_vm11 = vcmp.eq.s32.totalorder %v2074_v23, %v306_v41  ;;  %v118_v43 = vpop.permute.xlu0 %117 }
 0x192   :  { %v1634_v44 = vsel %vm854_vm11, 1.0, %v1915_v32  ;;  %vm823_vm7 = vcmp.eq.s32.totalorder %v2074_v23, %v118_v43 }
 0x193   :  { %v1247_v1 = vadd.f32 %v1634_v44, %v1246_v38  ;;  %v1603_v45 = vsel %vm823_vm7, 1.0, %v1915_v32  ;;  %vm2865_vm7 = vcmp.eq.s32.totalorder %v2074_v23, %v2190_v63 }
 0x194   :  { %v1206_v47 = vadd.f32 %v1603_v45, %v2315_v58 }
 0x195   :  { %v1248_v51 = vadd.f32 %v1635_v46, %v1247_v1 }
 0x196   :  { %v1207_v9 = vadd.f32 %v1604_v12, %v1206_v47  ;;  %1820 = vset.pattern.permute.xlu2 %v1994_v8  ;;  %548 = vperm.xlu1 %1819, %v2027_v15   ;;  %v1234_v8 = vrot.slane %v1233_v0, 1 }
 0x198   :  { %v1208_v57 = vadd.f32 %v1605_v31, %v1207_v9  ;;  %v428_v19 = vpop.permute.xlu2 %427  ;;  %v1235_v3 = vadd.f32 %v1234_v8, %v1233_v0 }
 0x199   :  { %vm874_vm12 = vcmp.eq.s32.totalorder %v2074_v23, %v428_v19 }
 0x19a   :  { %v1209_v58 = vrot.slane %v1208_v57, 4  ;;  %v1654_v31 = vsel %vm874_vm12, 1.0, %v1915_v32  ;;  %vm2868_vm12 = vcmp.eq.s32.totalorder %v2074_v23, %v2260_v26  ;;  %v1647_v26 = vsel %vm867_vm0, 1.0, %v1915_v32 }
 0x19c   :  { %v1210_v61 = vadd.f32 %v1209_v58, %v1208_v57 }
 0x19e   :  { %v1211_v24 = vrot.slane %v1210_v61, 2  ;;  %639 = vperm.xlu2 %1820, %v2033_v16   ;;  %1823 = vset.pattern.permute.xlu1 %v1991_v7 }
 0x1a0   :  { %v1212_v28 = vadd.f32 %v1211_v24, %v1210_v61  ;;  %v318_v30 = vpop.permute.xlu1 %317  ;;  %v409_v61 = vpop.permute.xlu0 %408  ;;  %v1670_v24 = vsel %vm890_vm13, 1.0, %v1915_v32  ;;  %vm2866_vm13 = vcmp.eq.s32.totalorder %v2074_v23, %v2209_v33  ;;  %v1645_v33 = vsel %vm2868_vm12, 1.0, %v1915_v32 }
 0x1a1   :  { %vm856_vm6 = vcmp.eq.s32.totalorder %v2074_v23, %v318_v30  ;;  %v1642_v30 = vsel %vm2865_vm7, 1.0, %v1915_v32  ;;  %vm871_vm0 = vcmp.eq.s32.totalorder %v2074_v23, %v409_v61 }
 0x1a2   :  { %v1213_v55 = vrot.slane %v1212_v28, 1  ;;  %v1636_v36 = vsel %vm856_vm6, 1.0, %v1915_v32  ;;  %vm869_vm6 = vcmp.eq.s32.totalorder %v2074_v23, %v2374_v40 }
 0x1a3   :  { %v1249_v48 = vadd.f32 %v1636_v36, %v1248_v51  ;;  %v1649_v62 = vsel %vm869_vm6, 1.0, %v1915_v32 }
 0x1a4   :  { %v1214_v34 = vadd.f32 %v1213_v55, %v1212_v28  ;;  %v1672_v28 = vsel %vm892_vm5, 1.0, %v1915_v32  ;;  %vm2867_vm5 = vcmp.eq.s32.totalorder %v2074_v23, %v2159_v56 }
 0x1a5   :  { %v1250_v25 = vadd.f32 %v1637_v6, %v1249_v48 }
 0x1a6   :  { %v1372_v37 = vsel %vm1371_vm14, %v1235_v3, %v1214_v34  ;;  %736 = vperm.xlu2 %1820, %v2352_v35   ;;  %457 = vperm.xlu1 %1823, %v2322_v59   ;;  %v1643_v3 = vsel %vm2866_vm13, 1.0, %v1915_v32  ;;  %vm2869_vm14 = vcmp.eq.s32.totalorder %v2074_v23, %v2343_v22 }
 0x1a7   :  { %v1251_v38 = vrot.slane %v1250_v25, 4 }
 0x1a8   :  { %v343_v39 = vpop.permute.xlu2 %342 }
 0x1a9   :  { %v1252_v41 = vadd.f32 %v1251_v38, %v1250_v25  ;;  %vm860_vm1 = vcmp.eq.s32.totalorder %v2074_v23, %v343_v39  ;;  %v1686_v25 = vsel %vm2867_vm5, 1.0, %v1915_v32  ;;  %v415_v38 = vpop.permute.xlu0 %414 }
 0x1aa   :  { %v1640_v47 = vsel %vm860_vm1, 1.0, %v1915_v32 }
 0x1ab   :  { %v1253_v43 = vrot.slane %v1252_v41, 2 }
 0x1ad   :  { %v1254_v44 = vadd.f32 %v1253_v43, %v1252_v41 }
 0x1ae   :  { %1824 = vset.pattern.permute.xlu2 %v1968_v2  ;;  %554 = vperm.xlu1 %1823, %v2027_v15  }
 0x1af   :  { %v1255_v1 = vrot.slane %v1254_v44, 1 }
 0x1b0   :  { %v337_v45 = vpop.permute.xlu1 %336  ;;  %v440_v27 = vpop.permute.xlu2 %439 }
 0x1b1   :  { %v1256_v46 = vadd.f32 %v1255_v1, %v1254_v44  ;;  %vm859_vm9 = vcmp.eq.s32.totalorder %v2074_v23, %v337_v45  ;;  %vm876_vm3 = vcmp.eq.s32.totalorder %v2074_v23, %v440_v27  ;;  %v1648_v44 = vsel %vm2869_vm14, 1.0, %v1915_v32 }
 0x1b2   :  { %v1639_v2 = vsel %vm859_vm9, 1.0, %v1915_v32  ;;  %v1656_v58 = vsel %vm876_vm3, 1.0, %v1915_v32  ;;  %v1651_v27 = vsel %vm871_vm0, 1.0, %v1915_v32 }
 0x1b3   :  { %v2454_v12 = vsel %vm1373_vm8, %v1256_v46, %v1372_v37  ;;  %v1257_v51 = vadd.f32 %v1639_v2, %v1638_v5  ;;  %vm872_vm8 = vcmp.eq.s32.totalorder %v2074_v23, %v415_v38 }
 0x1b5   :  { %v1258_v9 = vadd.f32 %v1640_v47, %v1257_v51 }
 0x1b6   :  { %645 = vperm.xlu2 %1824, %v2033_v16   ;;  %1826 = vset.pattern.permute.xlu1 %v2009_v11 }
 0x1b8   :  { %v434_v49 = vpop.permute.xlu1 %433 }
 0x1b9   :  { %vm875_vm10 = vcmp.eq.s32.totalorder %v2074_v23, %v434_v49  ;;  %v421_v22 = vpop.permute.xlu0 %420 }
 0x1ba   :  { %v1655_v4 = vsel %vm875_vm10, 1.0, %v1915_v32  ;;  %vm873_vm9 = vcmp.eq.s32.totalorder %v2074_v23, %v421_v22 }
 0x1bb   :  { %v1278_v57 = vadd.f32 %v1655_v4, %v1654_v31 }
 0x1bd   :  { %v2464_v0 = vadd.f32 %v1656_v58, %v1278_v57 }
 0x1be   :  { %742 = vperm.xlu2 %1824, %v2352_v35   ;;  %463 = vperm.xlu1 %1826, %v2322_v59  }
 0x1c0   :  { %v349_v8 = vpop.permute.xlu2 %348  ;;  %v531_v19 = vpop.permute.xlu1 %530 }
 0x1c1   :  { %vm861_vm15 = vcmp.eq.s32.totalorder %v2074_v23, %v349_v8  ;;  %vm891_vm11 = vcmp.eq.s32.totalorder %v2074_v23, %v531_v19 }
 0x1c2   :  { %v1641_v55 = vsel %vm861_vm15, 1.0, %v1915_v32  ;;  %v1671_v53 = vsel %vm891_vm11, 1.0, %v1915_v32  ;;  %vm1375_vm15 = vcmask 1043459  }
 0x1c3   :  { %v1259_v36 = vadd.f32 %v1641_v55, %v1258_v9  ;;  %v1299_v48 = vadd.f32 %v1671_v53, %v1670_v24  ;;  %v1653_v9 = vsel %vm873_vm9, 1.0, %v1915_v32 }
 0x1c5   :  { %v1260_v34 = vadd.f32 %v1642_v30, %v1259_v36  ;;  %v2488_v6 = vadd.f32 %v1672_v28, %v1299_v48 }
 0x1c6   :  { %1827 = vset.pattern.permute.xlu2 %v1991_v7  ;;  %560 = vperm.xlu1 %1826, %v2027_v15   ;;  %v1646_v7 = vsel %vm866_vm4, 1.0, %v1915_v32  ;;  %vm870_vm4 = vcmp.eq.s32.totalorder %v2074_v23, %v2410_v50  ;;  %v1652_v50 = vsel %vm872_vm8, 1.0, %v1915_v32 }
 0x1c7   :  { %v1261_v63 = vadd.f32 %v1643_v3, %v1260_v34  ;;  %v1650_v40 = vsel %vm870_vm4, 1.0, %v1915_v32 }
 0x1c8   :  { %v628_v37 = vpop.permute.xlu1 %627 }
 0x1c9   :  { %v1262_v39 = vadd.f32 %v1644_v60, %v1261_v63  ;;  %vm907_vm2 = vcmp.eq.s32.totalorder %v2074_v23, %v628_v37 }
 0x1ca   :  { %v1687_v42 = vsel %vm907_vm2, 1.0, %v1915_v32 }
 0x1cb   :  { %v1263_v41 = vadd.f32 %v1645_v33, %v1262_v39  ;;  %v1320_v56 = vadd.f32 %v1687_v42, %v1686_v25 }
 0x1cd   :  { %v1264_v43 = vadd.f32 %v1646_v7, %v1263_v41 }
 0x1ce   :  { %651 = vperm.xlu2 %1827, %v2033_v16   ;;  %1829 = vset.pattern.permute.xlu1 %v2006_v10 }
 0x1cf   :  { %v1265_v52 = vadd.f32 %v1647_v26, %v1264_v43 }
 0x1d0   :  { %v725_v1 = vpop.permute.xlu2 %724 }
 0x1d1   :  { %v1266_v5 = vadd.f32 %v1648_v44, %v1265_v52  ;;  %vm923_vm1 = vcmp.eq.s32.totalorder %v2074_v23, %v725_v1 }
 0x1d2   :  { %v1703_v2 = vsel %vm923_vm1, 1.0, %v1915_v32 }
 0x1d3   :  { %v1267_v45 = vadd.f32 %v1649_v62, %v1266_v5 }
 0x1d5   :  { %v1268_v46 = vadd.f32 %v1650_v40, %v1267_v45 }
 0x1d6   :  { %748 = vperm.xlu2 %1827, %v2352_v35   ;;  %469 = vperm.xlu1 %1829, %v2322_v59  }
 0x1d7   :  { %v1269_v47 = vadd.f32 %v1651_v27, %v1268_v46 }
 0x1d8   :  { %v719_v51 = vpop.permute.xlu1 %718 }
 0x1d9   :  { %v1270_v49 = vadd.f32 %v1652_v50, %v1269_v47  ;;  %vm922_vm3 = vcmp.eq.s32.totalorder %v2074_v23, %v719_v51 }
 0x1da   :  { %v1702_v31 = vsel %vm922_vm3, 1.0, %v1915_v32 }
 0x1db   :  { %v1341_v4 = vadd.f32 %v1703_v2, %v1702_v31  ;;  %v1271_v57 = vadd.f32 %v1653_v9, %v1270_v49 }
 0x1dd   :  { %v1272_v58 = vrot.slane %v1271_v57, 4 }
 0x1de   :  { %1830 = vset.pattern.permute.xlu2 %v2009_v11  ;;  %566 = vperm.xlu1 %1829, %v2027_v15  }
 0x1df   :  { %v1273_v61 = vadd.f32 %v1272_v58, %v1271_v57 }
 0x1e0   :  { %v634_v24 = vpop.permute.xlu2 %633 }
 0x1e1   :  { %v1274_v8 = vrot.slane %v1273_v61, 2  ;;  %vm908_vm10 = vcmp.eq.s32.totalorder %v2074_v23, %v634_v24 }
 0x1e2   :  { %v1688_v19 = vsel %vm908_vm10, 1.0, %v1915_v32 }
 0x1e3   :  { %v1275_v28 = vadd.f32 %v1274_v8, %v1273_v61  ;;  %v1321_v30 = vadd.f32 %v1688_v19, %v1320_v56 }
 0x1e5   :  { %v1276_v55 = vrot.slane %v1275_v28, 1 }
 0x1e6   :  { %657 = vperm.xlu2 %1830, %v2033_v16   ;;  %1831 = vset.pattern.permute.xlu1 %v2094_v29 }
 0x1e7   :  { %v1277_v53 = vadd.f32 %v1276_v55, %v1275_v28 }
 0x1e8   :  { %v731_v36 = vpop.permute.xlu2 %730  ;;  %v446_v11 = vpop.permute.xlu1 %445 }
 0x1e9   :  { %v2545_v48 = vsel %vm1375_vm15, %v1277_v53, %v2454_v12  ;;  %vm924_vm11 = vcmp.eq.s32.totalorder %v2074_v23, %v731_v36  ;;  %vm877_vm7 = vcmp.eq.s32.totalorder %v2074_v23, %v446_v11 }
 0x1ea   :  { %v1704_v3 = vsel %vm924_vm11, 1.0, %v1915_v32  ;;  %v1657_v34 = vsel %vm877_vm7, 1.0, %v1915_v32 }
 0x1eb   :  { %v1342_v60 = vadd.f32 %v1704_v3, %v1341_v4  ;;  %v1280_v63 = vadd.f32 %v1657_v34, %v2464_v0 }
 0x1ee   :  { %754 = vperm.xlu2 %1830, %v2352_v35   ;;  %475 = vperm.xlu1 %1831, %v2322_v59  }
 0x1f0   :  { %v543_v25 = vpop.permute.xlu1 %542 }
 0x1f1   :  { %vm893_vm13 = vcmp.eq.s32.totalorder %v2074_v23, %v543_v25 }
 0x1f2   :  { %v1673_v12 = vsel %vm893_vm13, 1.0, %v1915_v32 }
 0x1f3   :  { %v1301_v33 = vadd.f32 %v1673_v12, %v2488_v6 }
 0x1f6   :  { %1832 = vset.pattern.permute.xlu2 %v2006_v10  ;;  %572 = vperm.xlu1 %1831, %v2027_v15  }
 0x1f8   :  { %v640_v37 = vpop.permute.xlu2 %639 }
 0x1f9   :  { %vm909_vm5 = vcmp.eq.s32.totalorder %v2074_v23, %v640_v37 }
 0x1fa   :  { %v1689_v0 = vsel %vm909_vm5, 1.0, %v1915_v32 }
 0x1fb   :  { %v1322_v38 = vadd.f32 %v1689_v0, %v1321_v30 }
 0x1fe   :  { %663 = vperm.xlu2 %1832, %v2033_v16   ;;  %1834 = vset.pattern.permute.xlu1 %v2024_v14 }
 0x200   :  { %v737_v39 = vpop.permute.xlu2 %736  ;;  %v452_v7 = vpop.permute.xlu1 %451 }
 0x201   :  { %vm925_vm12 = vcmp.eq.s32.totalorder %v2074_v23, %v737_v39  ;;  %vm878_vm2 = vcmp.eq.s32.totalorder %v2074_v23, %v452_v7 }
 0x202   :  { %v1705_v10 = vsel %vm925_vm12, 1.0, %v1915_v32  ;;  %v1658_v6 = vsel %vm878_vm2, 1.0, %v1915_v32 }
 0x203   :  { %v1343_v42 = vadd.f32 %v1705_v10, %v1342_v60  ;;  %v1281_v41 = vadd.f32 %v1658_v6, %v1280_v63 }
 0x206   :  { %760 = vperm.xlu2 %1832, %v2352_v35   ;;  %481 = vperm.xlu1 %1834, %v2322_v59  }
 0x208   :  { %v549_v56 = vpop.permute.xlu1 %548 }
 0x209   :  { %vm894_vm6 = vcmp.eq.s32.totalorder %v2074_v23, %v549_v56 }
 0x20a   :  { %v1674_v26 = vsel %vm894_vm6, 1.0, %v1915_v32 }
 0x20b   :  { %v1302_v43 = vadd.f32 %v1674_v26, %v1301_v33 }
 0x20e   :  { %1835 = vset.pattern.permute.xlu2 %v2094_v29  ;;  %578 = vperm.xlu1 %1834, %v2027_v15  }
 0x210   :  { %v646_v44 = vpop.permute.xlu2 %645 }
 0x211   :  { %vm910_vm14 = vcmp.eq.s32.totalorder %v2074_v23, %v646_v44 }
 0x212   :  { %v1690_v52 = vsel %vm910_vm14, 1.0, %v1915_v32 }
 0x213   :  { %v1323_v62 = vadd.f32 %v1690_v52, %v1322_v38 }
 0x216   :  { %669 = vperm.xlu2 %1835, %v2033_v16   ;;  %1838 = vset.pattern.permute.xlu1 %v2021_v13 }
 0x218   :  { %v743_v1 = vpop.permute.xlu2 %742  ;;  %v458_v5 = vpop.permute.xlu1 %457 }
 0x219   :  { %vm926_vm4 = vcmp.eq.s32.totalorder %v2074_v23, %v743_v1  ;;  %vm879_vm0 = vcmp.eq.s32.totalorder %v2074_v23, %v458_v5 }
 0x21a   :  { %v1706_v29 = vsel %vm926_vm4, 1.0, %v1915_v32  ;;  %v1659_v40 = vsel %vm879_vm0, 1.0, %v1915_v32 }
 0x21b   :  { %v1344_v22 = vadd.f32 %v1706_v29, %v1343_v42  ;;  %v1282_v45 = vadd.f32 %v1659_v40, %v1281_v41 }
 0x21e   :  { %766 = vperm.xlu2 %1835, %v2352_v35   ;;  %487 = vperm.xlu1 %1838, %v2322_v59  }
 0x220   :  { %v555_v27 = vpop.permute.xlu1 %554 }
 0x221   :  { %vm895_vm1 = vcmp.eq.s32.totalorder %v2074_v23, %v555_v27 }
 0x222   :  { %v1675_v46 = vsel %vm895_vm1, 1.0, %v1915_v32 }
 0x223   :  { %v1303_v50 = vadd.f32 %v1675_v46, %v1302_v43 }
 0x226   :  { %1839 = vset.pattern.permute.xlu2 %v2024_v14  ;;  %584 = vperm.xlu1 %1838, %v2027_v15  }
 0x228   :  { %v652_v47 = vpop.permute.xlu2 %651 }
 0x229   :  { %vm911_vm8 = vcmp.eq.s32.totalorder %v2074_v23, %v652_v47 }
 0x22a   :  { %v1691_v2 = vsel %vm911_vm8, 1.0, %v1915_v32 }
 0x22b   :  { %v1324_v51 = vadd.f32 %v1691_v2, %v1323_v62 }
 0x22e   :  { %675 = vperm.xlu2 %1839, %v2033_v16   ;;  %1841 = vset.pattern.permute.xlu1 %v2042_v18 }
 0x230   :  { %v749_v9 = vpop.permute.xlu2 %748  ;;  %v464_v49 = vpop.permute.xlu1 %463 }
 0x231   :  { %vm927_vm9 = vcmp.eq.s32.totalorder %v2074_v23, %v749_v9  ;;  %vm880_vm3 = vcmp.eq.s32.totalorder %v2074_v23, %v464_v49 }
 0x232   :  { %v1707_v14 = vsel %vm927_vm9, 1.0, %v1915_v32  ;;  %v1660_v31 = vsel %vm880_vm3, 1.0, %v1915_v32 }
 0x233   :  { %v1345_v4 = vadd.f32 %v1707_v14, %v1344_v22  ;;  %v1283_v57 = vadd.f32 %v1660_v31, %v1282_v45 }
 0x236   :  { %772 = vperm.xlu2 %1839, %v2352_v35   ;;  %493 = vperm.xlu1 %1841, %v2322_v59  }
 0x238   :  { %v561_v58 = vpop.permute.xlu1 %560 }
 0x239   :  { %vm896_vm10 = vcmp.eq.s32.totalorder %v2074_v23, %v561_v58 }
 0x23a   :  { %v1676_v61 = vsel %vm896_vm10, 1.0, %v1915_v32 }
 0x23b   :  { %v1304_v24 = vadd.f32 %v1676_v61, %v1303_v50 }
 0x23e   :  { %1842 = vset.pattern.permute.xlu2 %v2021_v13  ;;  %590 = vperm.xlu1 %1841, %v2027_v15  }
 0x240   :  { %v658_v8 = vpop.permute.xlu2 %657 }
 0x241   :  { %vm912_vm15 = vcmp.eq.s32.totalorder %v2074_v23, %v658_v8 }
 0x242   :  { %v1692_v19 = vsel %vm912_vm15, 1.0, %v1915_v32 }
 0x243   :  { %v1325_v28 = vadd.f32 %v1692_v19, %v1324_v51 }
 0x246   :  { %681 = vperm.xlu2 %1842, %v2033_v16   ;;  %1844 = vset.pattern.permute.xlu1 %v2039_v17 }
 0x248   :  { %v755_v30 = vpop.permute.xlu2 %754  ;;  %v470_v55 = vpop.permute.xlu1 %469 }
 0x249   :  { %vm928_vm11 = vcmp.eq.s32.totalorder %v2074_v23, %v755_v30  ;;  %vm881_vm7 = vcmp.eq.s32.totalorder %v2074_v23, %v470_v55 }
 0x24a   :  { %v1708_v13 = vsel %vm928_vm11, 1.0, %v1915_v32  ;;  %v1661_v53 = vsel %vm881_vm7, 1.0, %v1915_v32 }
 0x24b   :  { %v1346_v36 = vadd.f32 %v1708_v13, %v1345_v4  ;;  %v1284_v11 = vadd.f32 %v1661_v53, %v1283_v57 }
 0x24e   :  { %778 = vperm.xlu2 %1842, %v2352_v35   ;;  %499 = vperm.xlu1 %1844, %v2322_v59  }
 0x250   :  { %v567_v3 = vpop.permute.xlu1 %566 }
 0x251   :  { %vm897_vm13 = vcmp.eq.s32.totalorder %v2074_v23, %v567_v3 }
 0x252   :  { %v1677_v34 = vsel %vm897_vm13, 1.0, %v1915_v32 }
 0x253   :  { %v1305_v60 = vadd.f32 %v1677_v34, %v1304_v24 }
 0x256   :  { %1845 = vset.pattern.permute.xlu2 %v2042_v18  ;;  %596 = vperm.xlu1 %1844, %v2027_v15  }
 0x258   :  { %v664_v63 = vpop.permute.xlu2 %663 }
 0x259   :  { %vm913_vm5 = vcmp.eq.s32.totalorder %v2074_v23, %v664_v63 }
 0x25a   :  { %v1693_v25 = vsel %vm913_vm5, 1.0, %v1915_v32 }
 0x25b   :  { %v1326_v12 = vadd.f32 %v1693_v25, %v1325_v28 }
 0x25e   :  { %687 = vperm.xlu2 %1845, %v2033_v16   ;;  %1846 = vset.pattern.permute.xlu1 %v2148_v54 }
 0x260   :  { %v761_v33 = vpop.permute.xlu2 %760  ;;  %v476_v37 = vpop.permute.xlu1 %475 }
 0x261   :  { %vm929_vm12 = vcmp.eq.s32.totalorder %v2074_v23, %v761_v33  ;;  %vm882_vm2 = vcmp.eq.s32.totalorder %v2074_v23, %v476_v37 }
 0x262   :  { %v1709_v18 = vsel %vm929_vm12, 1.0, %v1915_v32  ;;  %v1662_v0 = vsel %vm882_vm2, 1.0, %v1915_v32 }
 0x263   :  { %v1347_v38 = vadd.f32 %v1709_v18, %v1346_v36  ;;  %v1285_v39 = vadd.f32 %v1662_v0, %v1284_v11 }
 0x266   :  { %784 = vperm.xlu2 %1845, %v2352_v35   ;;  %505 = vperm.xlu1 %1846, %v2322_v59  }
 0x268   :  { %v573_v7 = vpop.permute.xlu1 %572 }
 0x269   :  { %vm898_vm6 = vcmp.eq.s32.totalorder %v2074_v23, %v573_v7 }
 0x26a   :  { %v1678_v10 = vsel %vm898_vm6, 1.0, %v1915_v32 }
 0x26b   :  { %v1306_v6 = vadd.f32 %v1678_v10, %v1305_v60 }
 0x26e   :  { %1847 = vset.pattern.permute.xlu2 %v2039_v17  ;;  %602 = vperm.xlu1 %1846, %v2027_v15  }
 0x270   :  { %v670_v42 = vpop.permute.xlu2 %669 }
 0x271   :  { %vm914_vm14 = vcmp.eq.s32.totalorder %v2074_v23, %v670_v42 }
 0x272   :  { %v1694_v41 = vsel %vm914_vm14, 1.0, %v1915_v32 }
 0x273   :  { %v1327_v56 = vadd.f32 %v1694_v41, %v1326_v12 }
 0x276   :  { %693 = vperm.xlu2 %1847, %v2033_v16   ;;  %1849 = vset.pattern.permute.xlu1 %v2057_v21 }
 0x278   :  { %v767_v26 = vpop.permute.xlu2 %766  ;;  %v482_v43 = vpop.permute.xlu1 %481 }
 0x279   :  { %vm930_vm4 = vcmp.eq.s32.totalorder %v2074_v23, %v767_v26  ;;  %vm883_vm0 = vcmp.eq.s32.totalorder %v2074_v23, %v482_v43 }
 0x27a   :  { %v1710_v17 = vsel %vm930_vm4, 1.0, %v1915_v32  ;;  %v1663_v44 = vsel %vm883_vm0, 1.0, %v1915_v32 }
 0x27b   :  { %v1348_v52 = vadd.f32 %v1710_v17, %v1347_v38  ;;  %v1286_v62 = vadd.f32 %v1663_v44, %v1285_v39 }
 0x27e   :  { %790 = vperm.xlu2 %1847, %v2352_v35   ;;  %511 = vperm.xlu1 %1849, %v2322_v59  }
 0x280   :  { %v579_v1 = vpop.permute.xlu1 %578 }
 0x281   :  { %vm899_vm1 = vcmp.eq.s32.totalorder %v2074_v23, %v579_v1 }
 0x282   :  { %v1679_v5 = vsel %vm899_vm1, 1.0, %v1915_v32 }
 0x283   :  { %v1307_v29 = vadd.f32 %v1679_v5, %v1306_v6  ;;  %v615_v5 = vpop.permute.xlu0 %614 }
 0x286   :  { %1850 = vset.pattern.permute.xlu2 %v2148_v54  ;;  %608 = vperm.xlu1 %1849, %v2027_v15  }
 0x288   :  { %v676_v40 = vpop.permute.xlu2 %675 }
 0x289   :  { %vm915_vm8 = vcmp.eq.s32.totalorder %v2074_v23, %v676_v40 }
 0x28a   :  { %v1695_v22 = vsel %vm915_vm8, 1.0, %v1915_v32 }
 0x28b   :  { %v1328_v45 = vadd.f32 %v1695_v22, %v1327_v56  ;;  %v1763_v56 = vld [vmem:[%s2857_s1 + $0x38] sm:$0xff] }
 0x28c   :  { %1452 = vmatpush.bf16.msra.mxu0 %v1763_v56 }
 0x28e   :  { %699 = vperm.xlu2 %1850, %v2033_v16   ;;  %1852 = vset.pattern.permute.xlu1 %v2054_v20 }
 0x290   :  { %v773_v27 = vpop.permute.xlu2 %772  ;;  %v488_v46 = vpop.permute.xlu1 %487 }
 0x291   :  { %vm931_vm9 = vcmp.eq.s32.totalorder %v2074_v23, %v773_v27  ;;  %vm884_vm3 = vcmp.eq.s32.totalorder %v2074_v23, %v488_v46  ;;  %v1760_v27 = vld [vmem:[%s2857_s1 + $0x20] sm:$0xff] }
 0x292   :  { %v1711_v54 = vsel %vm931_vm9, 1.0, %v1915_v32  ;;  %v1664_v15 = vsel %vm884_vm3, 1.0, %v1915_v32 }
 0x293   :  { %v1349_v50 = vadd.f32 %v1711_v54, %v1348_v52  ;;  %v1287_v47 = vadd.f32 %v1664_v15, %v1286_v62  ;;  %v1762_v52 = vld [vmem:[%s2857_s1 + $0x30] sm:$0xff]  ;;  %v1759_v15 = vld [vmem:[%s2857_s1 + $0x18] sm:$0xff] }
 0x294   :  { %1453 = vmatpush.bf16.msra.mxu0 %v1762_v52 }
 0x296   :  { %796 = vperm.xlu2 %1850, %v2352_v35   ;;  %517 = vperm.xlu1 %1852, %v2322_v59  }
 0x298   :  { %v585_v2 = vpop.permute.xlu1 %584 }
 0x299   :  { %vm900_vm10 = vcmp.eq.s32.totalorder %v2074_v23, %v585_v2  ;;  %v1758_v2 = vld [vmem:[%s2857_s1 + $0x10] sm:$0xff] }
 0x29a   :  { %v1680_v51 = vsel %vm900_vm10, 1.0, %v1915_v32  ;;  %vm905_vm10 = vcmp.eq.s32.totalorder %v2074_v23, %v615_v5 }
 0x29b   :  { %v1308_v9 = vadd.f32 %v1680_v51, %v1307_v29  ;;  %v1761_v29 = vld [vmem:[%s2857_s1 + $0x28] sm:$0xff] }
 0x29c   :  { %1454 = vmatpush.bf16.msra.mxu0 %v1761_v29 }
 0x29e   :  { %1853 = vset.pattern.permute.xlu2 %v2057_v21  ;;  %1854 = vset.pattern.permute.xlu1 %v2057_v21 }
 0x2a0   :  { %v682_v49 = vpop.permute.xlu2 %681  ;;  %1455 = vmatpush.bf16.msra.mxu0 %v1760_v27  ;;  %v1476_v27 = vld [vmem:[%s2858_s2 + $0x28] sm:$0xff] }
 0x2a1   :  { %vm916_vm15 = vcmp.eq.s32.totalorder %v2074_v23, %v682_v49  ;;  %v1757_v49 = vld [vmem:[%s2857_s1 + $0x8] sm:$0xff] }
 0x2a2   :  { %v1696_v14 = vsel %vm916_vm15, 1.0, %v1915_v32 }
 0x2a3   :  { %v1329_v31 = vadd.f32 %v1696_v14, %v1328_v45  ;;  %v1685_v45 = vsel %vm905_vm10, 1.0, %v1915_v32 }
 0x2a4   :  { %1456 = vmatpush.bf16.msra.mxu0 %v1759_v15  ;;  %v1472_v15 = vld [vmem:[%s2858_s2 + $0x8] sm:$0xff] }
 0x2a6   :  { %705 = vperm.xlu2 %1853, %v2033_v16   ;;  %802 = vperm.xlu1 %1854, %v2352_v35  }
 0x2a8   :  { %v779_v59 = vpop.permute.xlu2 %778  ;;  %v494_v4 = vpop.permute.xlu1 %493  ;;  %1457 = vmatpush.bf16.msra.mxu0 %v1758_v2  ;;  %v1527_v2 = vld [vmem:[%s2860_s4 + $0x70] sm:$0xff] }
 0x2a9   :  { %vm932_vm11 = vcmp.eq.s32.totalorder %v2074_v23, %v779_v59  ;;  %vm885_vm7 = vcmp.eq.s32.totalorder %v2074_v23, %v494_v4  ;;  %v1756_v59 = vld [vmem:[%s2857_s1] sm:$0xff] }
 0x2aa   :  { %v1712_v57 = vsel %vm932_vm11, 1.0, %v1915_v32  ;;  %v1665_v21 = vsel %vm885_vm7, 1.0, %v1915_v32 }
 0x2ab   :  { %v1350_v58 = vadd.f32 %v1712_v57, %v1349_v50  ;;  %v1288_v61 = vadd.f32 %v1665_v21, %v1287_v47 }
 0x2ac   :  { %1458 = vmatpush.bf16.msra.mxu0 %v1757_v49  ;;  %v1524_v49 = vld [vmem:[%s2860_s4 + $0x58] sm:$0xff] }
 0x2ae   :  { %1855 = vset.pattern.permute.xlu2 %v2054_v20 }
 0x2b0   :  { %v591_v24 = vpop.permute.xlu1 %590  ;;  %1459 = vmatpush.bf16.msra.mxu0 %v1756_v59  ;;  %v1522_v59 = vld [vmem:[%s2860_s4 + $0x48] sm:$0xff] }
 0x2b1   :  { %vm901_vm13 = vcmp.eq.s32.totalorder %v2074_v23, %v591_v24  ;;  %v1486_v24 = vld [vmem:[%s2858_s2 + $0x78] sm:$0xff] }
 0x2b2   :  { %v1681_v8 = vsel %vm901_vm13, 1.0, %v1915_v32  ;;  %1491 = vmatpush.msra.mxu1 %v1486_v24  ;;  %v1518_v24 = vld [vmem:[%s2860_s4 + $0x28] sm:$0xff] }
 0x2b3   :  { %v1309_v35 = vadd.f32 %v1681_v8, %v1308_v9  ;;  %v1485_v8 = vld [vmem:[%s2858_s2 + $0x70] sm:$0xff] }
 0x2b4   :  { %1492 = vmatpush.msra.mxu1 %v1485_v8 }
 0x2b6   :  { %711 = vperm.xlu2 %1855, %v2033_v16  }
 0x2b8   :  { %v688_v19 = vpop.permute.xlu2 %687 }
 0x2b9   :  { %vm917_vm5 = vcmp.eq.s32.totalorder %v2074_v23, %v688_v19 }
 0x2ba   :  { %v1697_v28 = vsel %vm917_vm5, 1.0, %v1915_v32 }
 0x2bb   :  { %v1330_v30 = vadd.f32 %v1697_v28, %v1329_v31 }
 0x2c0   :  { %v785_v55 = vpop.permute.xlu2 %784  ;;  %v500_v13 = vpop.permute.xlu1 %499 }
 0x2c1   :  { %vm933_vm12 = vcmp.eq.s32.totalorder %v2074_v23, %v785_v55  ;;  %vm886_vm2 = vcmp.eq.s32.totalorder %v2074_v23, %v500_v13  ;;  %v1484_v55 = vld [vmem:[%s2858_s2 + $0x68] sm:$0xff] }
 0x2c2   :  { %v1713_v20 = vsel %vm933_vm12, 1.0, %v1915_v32  ;;  %v1666_v53 = vsel %vm886_vm2, 1.0, %v1915_v32  ;;  %1493 = vmatpush.msra.mxu1 %v1484_v55  ;;  %vm1377_vm12 = vcmask 1044484   ;;  %vm1379_vm2 = vcmask 1045509   ;;  %v1516_v55 = vld [vmem:[%s2860_s4 + $0x18] sm:$0xff] }
 0x2c3   :  { %v1351_v36 = vadd.f32 %v1713_v20, %v1350_v58  ;;  %v1289_v11 = vadd.f32 %v1666_v53, %v1288_v61  ;;  %v2728_v61 = vld [vmem:[%s2856_s0] sm:$0xff] }
 0x2c4   :  { %vm29_vm13 = vcmp.ne.s32.totalorder %v2728_v61, 0  ;;  %v1483_v53 = vld [vmem:[%s2858_s2 + $0x60] sm:$0xff] }
 0x2c5   :  { %v1755_v19 = vsel %vm29_vm13, 1.0, %v1915_v32  ;;  %1494 = vmatpush.msra.mxu1 %v1483_v53  ;;  %v1513_v53 = vld [vmem:[%s2860_s4] sm:$0xff] }
 0x2c8   :  { %v597_v3 = vpop.permute.xlu1 %596 }
 0x2c9   :  { %vm902_vm6 = vcmp.eq.s32.totalorder %v2074_v23, %v597_v3 }
 0x2ca   :  { %v1682_v16 = vsel %vm902_vm6, 1.0, %v1915_v32 }
 0x2cb   :  { %v1310_v34 = vadd.f32 %v1682_v16, %v1309_v35  ;;  %v1482_v16 = vld [vmem:[%s2858_s2 + $0x58] sm:$0xff] }
 0x2cc   :  { %1495 = vmatpush.msra.mxu1 %v1482_v16 }
 0x2d0   :  { %v694_v60 = vpop.permute.xlu2 %693  ;;  %1466 = vadd.xlane.f32.xlu1 %v1755_v19 }
 0x2d1   :  { %vm918_vm14 = vcmp.eq.s32.totalorder %v2074_v23, %v694_v60 }
 0x2d2   :  { %v1698_v63 = vsel %vm918_vm14, 1.0, %v1915_v32 }
 0x2d3   :  { %v1331_v25 = vadd.f32 %v1698_v63, %v1330_v30  ;;  %v809_v63 = vpop.permute.xlu0 %808 }
 0x2d4   :  { %vm937_vm6 = vcmp.eq.s32.totalorder %v2074_v23, %v809_v63  ;;  %v1857_v63 = vld [vmem:[%s2861_s5] ss:$0 sm:$0xff] }
 0x2d5   :  { %v1717_v56 = vsel %vm937_vm6, 1.0, %v1915_v32 }
 0x2d8   :  { %v791_v12 = vpop.permute.xlu2 %790  ;;  %v506_v33 = vpop.permute.xlu1 %505 }
 0x2d9   :  { %vm934_vm4 = vcmp.eq.s32.totalorder %v2074_v23, %v791_v12  ;;  %vm887_vm0 = vcmp.eq.s32.totalorder %v2074_v23, %v506_v33 }
 0x2da   :  { %v1714_v37 = vsel %vm934_vm4, 1.0, %v1915_v32  ;;  %v1667_v18 = vsel %vm887_vm0, 1.0, %v1915_v32  ;;  %vm1381_vm4 = vcmask 1046534   ;;  %vm1383_vm0 = vcmask 1047559  }
 0x2db   :  { %v1352_v0 = vadd.f32 %v1714_v37, %v1351_v36  ;;  %v1290_v38 = vadd.f32 %v1667_v18, %v1289_v11 }
 0x2e0   :  { %v603_v39 = vpop.permute.xlu1 %602 }
 0x2e1   :  { %vm903_vm1 = vcmp.eq.s32.totalorder %v2074_v23, %v603_v39 }
 0x2e2   :  { %v1683_v7 = vsel %vm903_vm1, 1.0, %v1915_v32  ;;  %vm1764_vm1 = vcmp.ne.s32.totalorder %v2074_v23, 0 }
 0x2e3   :  { %v1311_v10 = vadd.f32 %v1683_v7, %v1310_v34 }
 0x2e8   :  { %v700_v6 = vpop.permute.xlu2 %699 }
 0x2e9   :  { %vm919_vm8 = vcmp.eq.s32.totalorder %v2074_v23, %v700_v6  ;;  %v1479_v6 = vld [vmem:[%s2858_s2 + $0x40] sm:$0xff] }
 0x2ea   :  { %v1699_v42 = vsel %vm919_vm8, 1.0, %v1915_v32  ;;  %vm1752_vm8 = vmpackc.low %vm1764_vm1, %vm1764_vm1 }
 0x2eb   :  { %v1332_v41 = vadd.f32 %v1699_v42, %v1331_v25  ;;  %v1481_v25 = vld [vmem:[%s2858_s2 + $0x50] sm:$0xff] }
 0x2ec   :  { %1496 = vmatpush.msra.mxu1 %v1481_v25 }
 0x2f0   :  { %v797_v26 = vpop.permute.xlu2 %796  ;;  %v512_v43 = vpop.permute.xlu1 %511 }
 0x2f1   :  { %vm935_vm9 = vcmp.eq.s32.totalorder %v2074_v23, %v797_v26  ;;  %vm888_vm3 = vcmp.eq.s32.totalorder %v2074_v23, %v512_v43  ;;  %v1478_v26 = vld [vmem:[%s2858_s2 + $0x38] sm:$0xff] }
 0x2f2   :  { %v1715_v17 = vsel %vm935_vm9, 1.0, %v1915_v32  ;;  %v1668_v44 = vsel %vm888_vm3, 1.0, %v1915_v32 }
 0x2f3   :  { %v2697_v62 = vadd.f32 %v1715_v17, %v1352_v0  ;;  %v1291_v1 = vadd.f32 %v1668_v44, %v1290_v38  ;;  %v1480_v0 = vld [vmem:[%s2858_s2 + $0x48] sm:$0xff]  ;;  %v1477_v17 = vld [vmem:[%s2858_s2 + $0x30] sm:$0xff] }
 0x2f4   :  { %1497 = vmatpush.msra.mxu1 %v1480_v0 }
 0x2f6   :  { %1498 = vmatpush.msra.mxu1 %v1479_v6 }
 0x2f8   :  { %v609_v40 = vpop.permute.xlu1 %608  ;;  %1499 = vmatpush.msra.mxu1 %v1478_v26 }
 0x2f9   :  { %vm904_vm15 = vcmp.eq.s32.totalorder %v2074_v23, %v609_v40 }
 0x2fa   :  { %v1684_v22 = vsel %vm904_vm15, 1.0, %v1915_v32  ;;  %1500 = vmatpush.msra.mxu1 %v1477_v17 }
 0x2fb   :  { %v1312_v46 = vadd.f32 %v1684_v22, %v1311_v10 }
 0x2fc   :  { %1501 = vmatpush.msra.mxu1 %v1476_v27 }
 0x2fd   :  { %v1313_v54 = vadd.f32 %v1685_v45, %v1312_v46  ;;  %v1475_v46 = vld [vmem:[%s2858_s2 + $0x20] sm:$0xff] }
 0x2fe   :  { %1502 = vmatpush.msra.mxu1 %v1475_v46 }
 0x2ff   :  { %v1314_v9 = vrot.slane %v1313_v54, 4 }
 0x300   :  { %v706_v50 = vpop.permute.xlu2 %705 }
 0x301   :  { %vm920_vm11 = vcmp.eq.s32.totalorder %v2074_v23, %v706_v50  ;;  %v1315_v14 = vadd.f32 %v1314_v9, %v1313_v54  ;;  %v1474_v54 = vld [vmem:[%s2858_s2 + $0x18] sm:$0xff]  ;;  %v1471_v50 = vld [vmem:[%s2858_s2] sm:$0xff] }
 0x302   :  { %v1700_v47 = vsel %vm920_vm11, 1.0, %v1915_v32  ;;  %1503 = vmatpush.msra.mxu1 %v1474_v54  ;;  %v1525_v9 = vld [vmem:[%s2860_s4 + $0x60] sm:$0xff] }
 0x303   :  { %v1333_v51 = vadd.f32 %v1700_v47, %v1332_v41  ;;  %v1316_v21 = vrot.slane %v1315_v14, 2  ;;  %v1528_v47 = vld [vmem:[%s2860_s4 + $0x78] sm:$0xff] }
 0x304   :  { %1533 = vmatpush.msra.mxu2 %v1528_v47 }
 0x305   :  { %v1317_v28 = vadd.f32 %v1316_v21, %v1315_v14  ;;  %v1523_v14 = vld [vmem:[%s2860_s4 + $0x50] sm:$0xff]  ;;  %v1520_v21 = vld [vmem:[%s2860_s4 + $0x38] sm:$0xff] }
 0x306   :  { %1534 = vmatpush.msra.mxu2 %v1527_v2 }
 0x307   :  { %v1318_v3 = vrot.slane %v1317_v28, 1 }
 0x308   :  { %v518_v31 = vpop.permute.xlu1 %517 }
 0x309   :  { %vm889_vm7 = vcmp.eq.s32.totalorder %v2074_v23, %v518_v31  ;;  %v1319_v37 = vadd.f32 %v1318_v3, %v1317_v28 }
 0x30a   :  { %v1669_v4 = vsel %vm889_vm7, 1.0, %v1915_v32 }
 0x30b   :  { %v1292_v57 = vadd.f32 %v1669_v4, %v1291_v1 }
 0x30d   :  { %v1293_v58 = vrot.slane %v1292_v57, 4 }
 0x30f   :  { %v1294_v35 = vadd.f32 %v1293_v58, %v1292_v57  ;;  %v1521_v57 = vld [vmem:[%s2860_s4 + $0x40] sm:$0xff]  ;;  %v1519_v58 = vld [vmem:[%s2860_s4 + $0x30] sm:$0xff] }
 0x310   :  { %v712_v30 = vpop.permute.xlu2 %711 }
 0x311   :  { %v1295_v13 = vrot.slane %v1294_v35, 2  ;;  %vm921_vm5 = vcmp.eq.s32.totalorder %v2074_v23, %v712_v30  ;;  %v1517_v30 = vld [vmem:[%s2860_s4 + $0x20] sm:$0xff] }
 0x312   :  { %v1701_v20 = vsel %vm921_vm5, 1.0, %v1915_v32 }
 0x313   :  { %v1296_v36 = vadd.f32 %v1295_v13, %v1294_v35  ;;  %v1334_v11 = vadd.f32 %v1701_v20, %v1333_v51  ;;  %v1526_v51 = vld [vmem:[%s2860_s4 + $0x68] sm:$0xff]  ;;  %v1515_v13 = vld [vmem:[%s2860_s4 + $0x10] sm:$0xff] }
 0x314   :  { %1535 = vmatpush.msra.mxu2 %v1526_v51  ;;  %v1514_v20 = vld [vmem:[%s2860_s4 + $0x8] sm:$0xff]  ;;  %s1917_s4 = smov [#allocation4]  }
 0x315   :  { %v1297_v34 = vrot.slane %v1296_v36, 1  ;;  %v1335_v60 = vrot.slane %v1334_v11, 4  ;;  %s1570_s22 = sshll.u32 %s1917_s4, 4  ;;  %s1571_s22 = int_to_ptr.vmem [resolvable:$true] %s1570_s22 }
 0x316   :  { %1536 = vmatpush.msra.mxu2 %v1525_v9 }
 0x317   :  { %v1298_v12 = vadd.f32 %v1297_v34, %v1296_v36  ;;  %v1336_v33 = vadd.f32 %v1335_v60, %v1334_v11  ;;  %v1856_v36 = vld [vmem:[%s2859_s3] ss:$0 sm:$0xff]  ;;  %s1572_s3 = sshll.u32 %s2863_s7, 4  ;;  %v1918_v34 = vmov 0   ;;  %s1573_s3 = int_to_ptr.hbm [resolvable:$true] %s1572_s3 }
 0x318   :  { %v803_v18 = vpop.permute.xlu1 %802  ;;  %1537 = vmatpush.msra.mxu2 %v1524_v49  ;;  %v30_v60 = vsel %vm29_vm13, 1, %v1918_v34 }
 0x319   :  { %v1337_v38 = vrot.slane %v1336_v33, 2  ;;  %vm936_vm14 = vcmp.eq.s32.totalorder %v2074_v23, %v803_v18  ;;  %v1378_v39 = vsel %vm1377_vm12, %v1298_v12, %v2545_v48  ;;  %v1473_v23 = vld [vmem:[%s2858_s2 + $0x10] sm:$0xff]  ;;  %31 = vst [vmem:[#allocation4] sm:$0xff] %v30_v60 }
 0x31a   :  { %v1716_v7 = vsel %vm936_vm14, 1.0, %v1915_v32  ;;  %v1380_v10 = vsel %vm1379_vm2, %v1319_v37, %v1378_v39  ;;  %1504 = vmatpush.msra.mxu1 %v1473_v23  ;;  %1538 = vmatpush.msra.mxu2 %v1523_v14  ;;  %1575 = dma.vmem_to_hbm [thread:$0]  %s1571_s22, 128, %s1573_s3, [#allocation5]  }
 0x31b   :  { %v1338_v42 = vadd.f32 %v1337_v38, %v1336_v33  ;;  %v1354_v41 = vadd.f32 %v1716_v7, %v2697_v62 }
 0x31c   :  { %1505 = vmatpush.msra.mxu1 %v1472_v15  ;;  %1539 = vmatpush.msra.mxu2 %v1522_v59 }
 0x31d   :  { %v1339_v43 = vrot.slane %v1338_v42, 1  ;;  %v1355_v48 = vadd.f32 %v1717_v56, %v1354_v41 }
 0x31e   :  { %1506 = vmatpush.msra.mxu1 %v1471_v50  ;;  %1540 = vmatpush.msra.mxu2 %v1521_v57 }
 0x31f   :  { %v1340_v44 = vadd.f32 %v1339_v43, %v1338_v42  ;;  %v1356_v52 = vrot.slane %v1355_v48, 4 }
 0x320   :  { %1541 = vmatpush.msra.mxu2 %v1520_v21 }
 0x321   :  { %v1357_v1 = vadd.f32 %v1356_v52, %v1355_v48  ;;  %v1382_v62 = vsel %vm1381_vm4, %v1340_v44, %v1380_v10 }
 0x322   :  { %1542 = vmatpush.msra.mxu2 %v1519_v58 }
 0x323   :  { %v1358_v5 = vrot.slane %v1357_v1, 2 }
 0x324   :  { %1543 = vmatpush.msra.mxu2 %v1518_v24 }
 0x325   :  { %v1359_v32 = vadd.f32 %v1358_v5, %v1357_v1 }
 0x326   :  { %1544 = vmatpush.msra.mxu2 %v1517_v30 }
 0x327   :  { %v1360_v29 = vrot.slane %v1359_v32, 1 }
 0x328   :  { %1545 = vmatpush.msra.mxu2 %v1516_v55 }
 0x329   :  { %v1361_v40 = vadd.f32 %v1360_v29, %v1359_v32 }
 0x32a   :  { %1546 = vmatpush.msra.mxu2 %v1515_v13 }
 0x32b   :  { %v1384_v22 = vsel %vm1383_vm0, %v1361_v40, %v1382_v62 }
 0x32c   :  { %v1753_v45 = vpack.c.bf16 %v1384_v22, %v1384_v22  ;;  %1547 = vmatpush.msra.mxu2 %v1514_v20 }
 0x32e   :  { %1754 = vmatmul.msk.bf16.vlgmr.msra.gmra.mxu0 %vm1752_vm8, %v1753_v45  ;;  %1548 = vmatpush.msra.mxu2 %v1513_v53 }
 0x343   :  { %v1467_v31 = vpop.xlane.xlu1 %1466 }
 0x344   :  { %v1468_v4 = vmax.f32 %v1467_v31, 1.0 }
 0x346   :  { %1858 = vrcp.f32 %v1468_v4 }
 0x34c   :  { %v1859_v8 = vpop.eup %1858 }
 0x3ab   :  { %v1461_v35 = vpop.f32.mrf.mxu0 }
 0x3ac   :  { %v1470_v19 = vmul.f32 %v1859_v8, %v1461_v35 }
 0x3ae   :  { %1507 = vmatmul.f32.vlgmr.msra.gmra.mxu1 %v1470_v19 }
 0x3b3   :  { %v1463_v28 = vpop.f32.mrf.mxu0 }
 0x42b   :  { %v1508_v11 = vpop.f32.mrf.mxu1 }
 0x42c   :  { %v1509_v3 = vadd.f32 %v1856_v36, %v1508_v11 }
 0x42e   :  { %1860 = vtanh.f32 %v1509_v3 }
 0x434   :  { %v1861_v16 = vpop.eup %1860 }
 0x435   :  { %1512 = vst [vmem:[#allocation2] sm:$0xff] %v1861_v16  ;;  %1549 = vmatmul.f32.vlgmr.msra.gmra.mxu2 %v1861_v16 }
 0x436   :  { %1564 = dma.vmem_to_hbm [thread:$0]  %s1560_s18, 128, %s1562_s21, [#allocation3]  }
 0x4b8   :  { %v1550_v25 = vpop.f32.mrf.mxu2 }
 0x4b9   :  { %v1551_v12 = vadd.f32 %v1857_v63, %v1550_v25 }
 0x4bb   :  { %1553 = vst [vmem:[%s2864_s8] sm:$0xff] %v1551_v12 }
 0x4bc   :  { %1911 = dma.done.wait [#allocation3], 128  }
 0x4bd   :  { %1912 = vsyncadd [#allocation3], 4294967168 }
 0x4be   :  { %1913 = dma.done.wait [#allocation5], 128  }
 0x4bf   :  { %1914 = vsyncadd [#allocation5], 4294967168 }
 0x4c0   :  { %1588 = vsyncpa [#allocation3], 1 }
 0x4c1   :  { %1589 = vsyncpa [#allocation5], 1 }

</bundles_post_ra>
